<compile_context>
chip_gen: v7x
topology: tpu7x:2x2x1
jax: 0.10.0
libtpu: 0.0.40
codegen_flags: <defaults>
</compile_context>

<pallas_src>
import math
import functools

import jax
import jax.numpy as jnp
from jax import lax
from jax.experimental import pallas as pl
from jax.experimental.pallas import tpu as pltpu


# ---------------------------------------------------------------------------
# Per-generation tuning.
# ---------------------------------------------------------------------------
def _device_kind():
    try:
        return jax.devices()[0].device_kind.lower()
    except Exception:
        return ""


def _tuning():
    kind = _device_kind()
    if "v5" in kind or "v6" in kind:
        # v5e/v5p/v6e: 128 MiB physical VMEM -> larger scoped cap + larger seq tiles.
        vmem_limit = 100 * 1024 * 1024
        max_tile = 512
    else:
        # v7x (64 MiB physical per TC) and unknown chips: conservative cap/tiles.
        vmem_limit = 48 * 1024 * 1024
        max_tile = 256
    # v5e (~0.82 TB/s HBM): deeper K/V pipelining to hide the per-kv-step fetch.
    is_v5e = ("v5e" in kind) or ("v5 lite" in kind) or ("v5litepod" in kind)
    kv_buffers = 3 if is_v5e else 2
    return vmem_limit, max_tile, kv_buffers


def _pick_tile(n, max_tile):
    t = max_tile
    while t >= 128:
        if n % t == 0:
            return t
        t //= 2
    return n  # short / odd sequence lengths: single full-size tile


def _spec(shape, index_map, mode=None):
    """BlockSpec helper; only passes pipeline_mode when a hint is requested."""
    if mode is None:
        return pl.BlockSpec(shape, index_map)
    return pl.BlockSpec(shape, index_map, pipeline_mode=mode)


# ---------------------------------------------------------------------------
# In-kernel math helpers (f32, VPU/EUP friendly).
# ---------------------------------------------------------------------------
def _layernorm(x, g, b, eps=1e-5):
    mu = jnp.mean(x, axis=-1, keepdims=True)
    var = jnp.mean((x - mu) ** 2, axis=-1, keepdims=True)
    return (x - mu) * lax.rsqrt(var + eps) * g + b


def _erf_approx(x):
    # Abramowitz & Stegun 7.1.26, |err| < 1.5e-7; only exp + elementwise VPU ops.
    a1, a2, a3, a4, a5 = 0.254829592, -0.284496736, 1.421413741, -1.453152027, 1.061405429
    p = 0.3275911
    ax = jnp.abs(x)
    t = 1.0 / (1.0 + p * ax)
    poly = ((((a5 * t + a4) * t + a3) * t + a2) * t + a1) * t
    y = 1.0 - poly * jnp.exp(-(ax * ax))
    return jnp.where(x < 0.0, -y, y)


def _gelu(x):
    # Exact (erf-based) GELU, matching nn.GELU() default.
    return 0.5 * x * (1.0 + _erf_approx(x * (1.0 / math.sqrt(2.0))))


# ---------------------------------------------------------------------------
# Kernel 1: ln1 + fused QKV projection -> head-major bf16 Q/K/V.
# ---------------------------------------------------------------------------
def _qkv_kernel(num_heads, head_dim,
                x_ref, ln1g_ref, ln1b_ref, wqkv_ref, bqkv_ref,
                q_ref, k_ref, v_ref):
    y = _layernorm(x_ref[0], ln1g_ref[...], ln1b_ref[...]).astype(jnp.bfloat16)
    d = head_dim
    for h in range(num_heads):
        # Fused QKV: one MXU pass per head with N = 3*Dh (vs. three Dh-wide matmuls).
        qkv = jnp.dot(y, wqkv_ref[h], preferred_element_type=jnp.float32) + bqkv_ref[h]
        q_ref[0, h] = qkv[:, 0 * d:1 * d].astype(jnp.bfloat16)
        k_ref[0, h] = qkv[:, 1 * d:2 * d].astype(jnp.bfloat16)
        v_ref[0, h] = qkv[:, 2 * d:3 * d].astype(jnp.bfloat16)


# ---------------------------------------------------------------------------
# Kernel 2: flash attention (online softmax over kv grid axis) + out-proj +
#           residual + ln2 + MLP + residual.
# ---------------------------------------------------------------------------
def _attn_mlp_kernel(x_ref, q_ref, k_ref, v_ref,
                     wo_ref, bo_ref, ln2g_ref, ln2b_ref,
                     w1_ref, b1_ref, w2_ref, b2_ref,
                     out_ref,
                     m_sc, l_sc, acc_sc):
    kv = pl.program_id(2)

    @pl.when(kv == 0)
    def _init():
        m_sc[...] = jnp.full(m_sc.shape, -jnp.inf, jnp.float32)
        l_sc[...] = jnp.zeros(l_sc.shape, jnp.float32)
        acc_sc[...] = jnp.zeros(acc_sc.shape, jnp.float32)

    q = q_ref[0]                                              # (H, Tq, Dh) bf16, pre-scaled
    k = k_ref[0]                                              # (H, Tk, Dh) bf16
    v = v_ref[0]                                              # (H, Tk, Dh) bf16

    # Scores: contract last dims (no k.T relayout), batched over heads.
    s = jnp.einsum("hqd,hkd->hqk", q, k, preferred_element_type=jnp.float32)
    m_prev = m_sc[...]
    m_new = jnp.maximum(m_prev, jnp.max(s, axis=-1, keepdims=True))
    alpha = jnp.exp(m_prev - m_new)
    # TODO(synk): on v6e/v7x, p = jnp.exp((s - m_new).astype(bf16)) roughly doubles EUP
    #             throughput in this loop; kept f32 here for accuracy margin (v5e has
    #             no bf16 EUP anyway).
    p = jnp.exp(s - m_new)
    l_sc[...] = alpha * l_sc[...] + jnp.sum(p, axis=-1, keepdims=True)
    acc_sc[...] = alpha * acc_sc[...] + jnp.einsum(
        "hqk,hkd->hqd", p.astype(jnp.bfloat16), v, preferred_element_type=jnp.float32)
    m_sc[...] = m_new

    @pl.when(kv == pl.num_programs(2) - 1)
    def _finalize():
        inv_l = pl.reciprocal(l_sc[...], approx=True)         # EUP slot
        ctx = (acc_sc[...] * inv_l).astype(jnp.bfloat16)      # (H, Tq, Dh)

        # Output projection: one batched MXU contraction + head-sum
        # (no Python head loop / per-head result-FIFO pops).
        attn = jnp.einsum("hqd,hde->hqe", ctx, wo_ref[...],
                          preferred_element_type=jnp.float32)
        attn = jnp.sum(attn, axis=0) + bo_ref[...]

        x1 = x_ref[0] + attn                                  # residual 1 (f32)

        z = _layernorm(x1, ln2g_ref[...], ln2b_ref[...]).astype(jnp.bfloat16)
        hdn = jnp.dot(z, w1_ref[...], preferred_element_type=jnp.float32) + b1_ref[...]
        hdn = _gelu(hdn)                                      # exact GELU (f32)
        mlp = jnp.dot(hdn.astype(jnp.bfloat16), w2_ref[...],
                      preferred_element_type=jnp.float32) + b2_ref[...]
        out_ref[0] = x1 + mlp                                 # residual 2


# ---------------------------------------------------------------------------
# Wrapper.
# ---------------------------------------------------------------------------
def self_attention_encoder_block(x, params, num_heads, *, use_pipeline_hints=True):
    """x: (B, S, E) f32; params: dict in kernel (x @ W) layout from init_params."""
    B, S, E = x.shape
    assert E % num_heads == 0, "embed_size must be divisible by num_heads"
    H = num_heads
    Dh = E // H
    Eh = 4 * E
    scale = 1.0 / math.sqrt(Dh)

    vmem_limit, max_tile, kv_buffers = _tuning()
    Tq = _pick_tile(S, max_tile)
    Tk = _pick_tile(S, max_tile)
    nq, nkv = S // Tq, S // Tk

    f32, bf16 = jnp.float32, jnp.bfloat16

    if use_pipeline_hints:
        const_mode = pl.Buffered(1)                          # constant-index weights: single buffer
        kv_mode = pl.Buffered(kv_buffers) if kv_buffers != 2 else None
    else:
        const_mode = None
        kv_mode = None

    # ---- host-side re-layout: fused head-major QKV slab + bf16 matmul operands ----
    wq_h = (params["wq"] * scale).reshape(E, H, Dh)
    wk_h = params["wk"].reshape(E, H, Dh)
    wv_h = params["wv"].reshape(E, H, Dh)
    wqkv = jnp.concatenate([wq_h, wk_h, wv_h], axis=-1)      # (E, H, 3*Dh)
    wqkv = wqkv.transpose(1, 0, 2).astype(bf16)              # (H, E, 3*Dh)
    bqkv = jnp.concatenate(
        [(params["bq"] * scale).reshape(H, Dh),
         params["bk"].reshape(H, Dh),
         params["bv"].reshape(H, Dh)], axis=-1).reshape(H, 1, 3 * Dh).astype(f32)
    wo_h = params["wo"].reshape(H, Dh, E).astype(bf16)       # (H, Dh, E)
    w1_b = params["w1"].astype(bf16)                         # (E, 4E)
    w2_b = params["w2"].astype(bf16)                         # (4E, E)

    ce_qkv = pl.CostEstimate(
        flops=6 * B * S * E * E,
        transcendentals=B * S,
        bytes_accessed=4 * B * S * E + 2 * 3 * E * E + 6 * B * S * E)
    ce_attn = pl.CostEstimate(
        flops=4 * B * H * S * S * Dh + 2 * B * S * E * E + 4 * B * S * E * Eh,
        transcendentals=B * H * S * S + B * S * Eh,
        bytes_accessed=8 * B * S * E + 6 * B * S * E + 2 * (E * E + 2 * E * Eh))

    # -------------------- call 1: ln1 + fused QKV --------------------
    q, k, v = pl.pallas_call(
        functools.partial(_qkv_kernel, H, Dh),
        out_shape=(
            jax.ShapeDtypeStruct((B, H, S, Dh), bf16),
            jax.ShapeDtypeStruct((B, H, S, Dh), bf16),
            jax.ShapeDtypeStruct((B, H, S, Dh), bf16),
        ),
        grid_spec=pltpu.PrefetchScalarGridSpec(
            num_scalar_prefetch=0,
            grid=(B, nq),
            in_specs=[
                _spec((1, Tq, E), lambda b, qi: (b, qi, 0)),                  # x tile
                _spec((1, E), lambda b, qi: (0, 0), const_mode),              # ln1 gamma
                _spec((1, E), lambda b, qi: (0, 0), const_mode),              # ln1 beta
                _spec((H, E, 3 * Dh), lambda b, qi: (0, 0, 0), const_mode),   # fused Wqkv
                _spec((H, 1, 3 * Dh), lambda b, qi: (0, 0, 0), const_mode),   # fused bqkv
            ],
            out_specs=(
                pl.BlockSpec((1, H, Tq, Dh), lambda b, qi: (b, 0, qi, 0)),
                pl.BlockSpec((1, H, Tq, Dh), lambda b, qi: (b, 0, qi, 0)),
                pl.BlockSpec((1, H, Tq, Dh), lambda b, qi: (b, 0, qi, 0)),
            ),
        ),
        compiler_params=pltpu.CompilerParams(
            dimension_semantics=("parallel", "parallel"),
            vmem_limit_bytes=vmem_limit),
        cost_estimate=ce_qkv,
    )(x, params["ln1_g"], params["ln1_b"], wqkv, bqkv)

    # ---- call 2: flash attention + out-proj + residual + ln2 + MLP + residual ----
    out = pl.pallas_call(
        _attn_mlp_kernel,
        out_shape=jax.ShapeDtypeStruct((B, S, E), f32),
        grid_spec=pltpu.PrefetchScalarGridSpec(
            num_scalar_prefetch=0,
            grid=(B, nq, nkv),                               # kv reduction innermost
            in_specs=[
                _spec((1, Tq, E), lambda b, qi, ki: (b, qi, 0)),              # x (residual)
                _spec((1, H, Tq, Dh), lambda b, qi, ki: (b, 0, qi, 0)),       # Q tile
                _spec((1, H, Tk, Dh), lambda b, qi, ki: (b, 0, ki, 0), kv_mode),  # K tile
                _spec((1, H, Tk, Dh), lambda b, qi, ki: (b, 0, ki, 0), kv_mode),  # V tile
                _spec((H, Dh, E), lambda b, qi, ki: (0, 0, 0), const_mode),   # Wo (head-major)
                _spec((1, E), lambda b, qi, ki: (0, 0), const_mode),          # bo
                _spec((1, E), lambda b, qi, ki: (0, 0), const_mode),          # ln2 gamma
                _spec((1, E), lambda b, qi, ki: (0, 0), const_mode),          # ln2 beta
                _spec((E, Eh), lambda b, qi, ki: (0, 0), const_mode),         # W1
                _spec((1, Eh), lambda b, qi, ki: (0, 0), const_mode),         # b1
                _spec((Eh, E), lambda b, qi, ki: (0, 0), const_mode),         # W2
                _spec((1, E), lambda b, qi, ki: (0, 0), const_mode),          # b2
            ],
            out_specs=pl.BlockSpec((1, Tq, E), lambda b, qi, ki: (b, qi, 0)),
            scratch_shapes=[
                pltpu.VMEM((H, Tq, 1), f32),     # running max m
                pltpu.VMEM((H, Tq, 1), f32),     # running denom l
                pltpu.VMEM((H, Tq, Dh), f32),    # running context accumulator
            ],
        ),
        compiler_params=pltpu.CompilerParams(
            dimension_semantics=("parallel", "parallel", "arbitrary"),
            vmem_limit_bytes=vmem_limit),
        cost_estimate=ce_attn,
    )(x, q, k, v, wo_h, params["bo"], params["ln2_g"], params["ln2_b"],
      w1_b, params["b1"], w2_b, params["b2"])
    return out


# ---------------------------------------------------------------------------
# Parameters & pure-JAX reference (mirrors the PyTorch forward in eval mode).
# ---------------------------------------------------------------------------
def init_params(key, embed_size):
    """Deterministic synthetic parameters in kernel layout.

    PyTorch stores nn.Linear / in_proj weights as (out, in) and applies x @ W.T + b.
    Here we pre-transpose so math is x @ W + b (f32 "math layout").
    """
    E = embed_size
    ks = jax.random.split(key, 8)
    s = 0.05
    in_proj_w = s * jax.random.normal(ks[0], (3 * E, E), jnp.float32)
    in_proj_b = s * jax.random.normal(ks[1], (3 * E,), jnp.float32)
    out_proj_w = s * jax.random.normal(ks[2], (E, E), jnp.float32)
    out_proj_b = s * jax.random.normal(ks[3], (E,), jnp.float32)
    w1 = s * jax.random.normal(ks[4], (4 * E, E), jnp.float32)
    b1 = s * jax.random.normal(ks[5], (4 * E,), jnp.float32)
    w2 = s * jax.random.normal(ks[6], (E, 4 * E), jnp.float32)
    b2 = s * jax.random.normal(ks[7], (E,), jnp.float32)

    return dict(
        ln1_g=jnp.ones((1, E), jnp.float32) * 1.1,
        ln1_b=jnp.full((1, E), 0.05, jnp.float32),
        wq=in_proj_w[0 * E:1 * E].T, bq=in_proj_b[0 * E:1 * E].reshape(1, E),
        wk=in_proj_w[1 * E:2 * E].T, bk=in_proj_b[1 * E:2 * E].reshape(1, E),
        wv=in_proj_w[2 * E:3 * E].T, bv=in_proj_b[2 * E:3 * E].reshape(1, E),
        wo=out_proj_w.T, bo=out_proj_b.reshape(1, E),
        ln2_g=jnp.ones((1, E), jnp.float32) * 0.9,
        ln2_b=jnp.full((1, E), -0.05, jnp.float32),
        w1=w1.T, b1=b1.reshape(1, 4 * E),
        w2=w2.T, b2=b2.reshape(1, E),
    )


def reference_block(x, p, num_heads):
    """Pure-JAX f32 reference mirroring the PyTorch forward (eval mode)."""
    B, S, E = x.shape
    Dh = E // num_heads
    y = _layernorm(x, p["ln1_g"], p["ln1_b"])
    q = y @ p["wq"] + p["bq"]
    k = y @ p["wk"] + p["bk"]
    v = y @ p["wv"] + p["bv"]
    qh = q.reshape(B, S, num_heads, Dh).transpose(0, 2, 1, 3) / math.sqrt(Dh)
    kh = k.reshape(B, S, num_heads, Dh).transpose(0, 2, 1, 3)
    vh = v.reshape(B, S, num_heads, Dh).transpose(0, 2, 1, 3)
    s = jnp.einsum("bhqd,bhkd->bhqk", qh, kh)
    pw = jax.nn.softmax(s, axis=-1)
    a = jnp.einsum("bhqk,bhkd->bhqd", pw, vh).transpose(0, 2, 1, 3).reshape(B, S, E)
    x = x + (a @ p["wo"] + p["bo"])
    z = _layernorm(x, p["ln2_g"], p["ln2_b"])
    h = z @ p["w1"] + p["b1"]
    h = jax.nn.gelu(h, approximate=False)        # exact erf-GELU (matches nn.GELU())
    return x + (h @ p["w2"] + p["b2"])


if __name__ == "__main__":
    B, S, E, H = 2, 8, 32, 4
    key = jax.random.PRNGKey(0)
    kx, kp = jax.random.split(key)
    x = jax.random.normal(kx, (B, S, E), jnp.float32)
    params = init_params(kp, E)

    def _run(hints):
        return jax.block_until_ready(
            self_attention_encoder_block(x, params, H, use_pipeline_hints=hints))

    try:
        out = _run(True)
    except Exception:
        # Fallback for jax builds that reject BlockSpec pipeline_mode / Buffered(1):
        # identical math, default double-buffering.
        out = _run(False)

    ref = reference_block(x, params, H)
    assert out.shape == (B, S, E)
    max_err = float(jnp.max(jnp.abs(out - ref)))
    # bf16 matmul operands (f32 accumulate) + approx reciprocal -> loosened tolerance.
    assert jnp.allclose(out, ref, rtol=2e-2, atol=2e-2), f"mismatch vs reference, max_err={max_err}"

    print("KERNEL_OK")
</pallas_src>

<mosaic_0001>
module attributes {stable_mosaic.version = 11 : i64} {
  func.func @_qkv_kernel(%arg0: i32, %arg1: i32, %arg2: memref<1x8x32xf32, #tpu.memory_space<vmem>>, %arg3: memref<1x32xf32, #tpu.memory_space<vmem>>, %arg4: memref<1x32xf32, #tpu.memory_space<vmem>>, %arg5: memref<4x32x24xbf16, #tpu.memory_space<vmem>>, %arg6: memref<4x1x24xf32, #tpu.memory_space<vmem>>, %arg7: memref<1x4x8x8xbf16, #tpu.memory_space<vmem>>, %arg8: memref<1x4x8x8xbf16, #tpu.memory_space<vmem>>, %arg9: memref<1x4x8x8xbf16, #tpu.memory_space<vmem>>) attributes {dimension_semantics = [#tpu.dimension_semantics<parallel>, #tpu.dimension_semantics<parallel>], iteration_bounds = array<i64: 2, 1>, scalar_prefetch = 0 : i64, scratch_operands = 0 : i64, tpu.core_type = #tpu.core_type<tc>, window_params = [{transform_indices = @transform_0, window_bounds = array<i64: 1, 8, 32>}, {pipeline_mode = #tpu.pipeline_mode<synchronous>, transform_indices = @transform_1, window_bounds = array<i64: 1, 32>}, {pipeline_mode = #tpu.pipeline_mode<synchronous>, transform_indices = @transform_2, window_bounds = array<i64: 1, 32>}, {pipeline_mode = #tpu.pipeline_mode<synchronous>, transform_indices = @transform_3, window_bounds = array<i64: 4, 32, 24>}, {pipeline_mode = #tpu.pipeline_mode<synchronous>, transform_indices = @transform_4, window_bounds = array<i64: 4, 1, 24>}, {transform_indices = @transform_5, window_bounds = array<i64: 1, 4, 8, 8>}, {transform_indices = @transform_6, window_bounds = array<i64: 1, 4, 8, 8>}, {transform_indices = @transform_7, window_bounds = array<i64: 1, 4, 8, 8>}]} {
    %c0 = arith.constant 0 : index
    %c0_0 = arith.constant 0 : index
    %c0_1 = arith.constant 0 : index
    %0 = vector.load %arg2[%c0, %c0_0, %c0_1] : memref<1x8x32xf32, #tpu.memory_space<vmem>>, vector<1x8x32xf32>
    %1 = vector.shape_cast %0 : vector<1x8x32xf32> to vector<8x32xf32>
    %c0_2 = arith.constant 0 : index
    %c0_3 = arith.constant 0 : index
    %2 = vector.load %arg3[%c0_2, %c0_3] : memref<1x32xf32, #tpu.memory_space<vmem>>, vector<1x32xf32>
    %c0_4 = arith.constant 0 : index
    %c0_5 = arith.constant 0 : index
    %3 = vector.load %arg4[%c0_4, %c0_5] : memref<1x32xf32, #tpu.memory_space<vmem>>, vector<1x32xf32>
    %cst = arith.constant dense<0.000000e+00> : vector<8xf32>
    %4 = vector.multi_reduction <add>, %1, %cst [1] : vector<8x32xf32> to vector<8xf32>
    %5 = vector.shape_cast %4 : vector<8xf32> to vector<8x1xf32>
    %cst_6 = arith.constant 3.200000e+01 : f32
    %6 = vector.broadcast %cst_6 : f32 to vector<8x1xf32>
    %7 = arith.divf %5, %6 : vector<8x1xf32>
    %8 = vector.broadcast %7 : vector<8x1xf32> to vector<8x32xf32>
    %9 = arith.subf %1, %8 : vector<8x32xf32>
    %10 = arith.mulf %9, %9 : vector<8x32xf32>
    %cst_7 = arith.constant dense<0.000000e+00> : vector<8xf32>
    %11 = vector.multi_reduction <add>, %10, %cst_7 [1] : vector<8x32xf32> to vector<8xf32>
    %12 = vector.shape_cast %11 : vector<8xf32> to vector<8x1xf32>
    %cst_8 = arith.constant 3.200000e+01 : f32
    %13 = vector.broadcast %cst_8 : f32 to vector<8x1xf32>
    %14 = arith.divf %12, %13 : vector<8x1xf32>
    %15 = vector.broadcast %7 : vector<8x1xf32> to vector<8x32xf32>
    %16 = arith.subf %1, %15 : vector<8x32xf32>
    %cst_9 = arith.constant 9.99999974E-6 : f32
    %17 = vector.broadcast %cst_9 : f32 to vector<8x1xf32>
    %18 = arith.addf %14, %17 : vector<8x1xf32>
    %19 = math.rsqrt %18 : vector<8x1xf32>
    %20 = vector.broadcast %19 : vector<8x1xf32> to vector<8x32xf32>
    %21 = arith.mulf %16, %20 : vector<8x32xf32>
    %22 = vector.broadcast %2 : vector<1x32xf32> to vector<8x32xf32>
    %23 = arith.mulf %21, %22 : vector<8x32xf32>
    %24 = vector.broadcast %3 : vector<1x32xf32> to vector<8x32xf32>
    %25 = arith.addf %23, %24 : vector<8x32xf32>
    %26 = arith.truncf %25 : vector<8x32xf32> to vector<8x32xbf16>
    %c0_10 = arith.constant 0 : index
    %c0_11 = arith.constant 0 : index
    %c0_12 = arith.constant 0 : index
    %27 = vector.load %arg5[%c0_10, %c0_11, %c0_12] : memref<4x32x24xbf16, #tpu.memory_space<vmem>>, vector<1x32x24xbf16>
    %28 = vector.shape_cast %27 : vector<1x32x24xbf16> to vector<32x24xbf16>
    %cst_13 = arith.constant dense<0.000000e+00> : vector<8x24xf32>
    %29 = tpu.matmul %26, %28, %cst_13 {dimension_numbers = #tpu.dot_dimension_numbers<[1], [0], [0], [1], [0, 0, 1, 1], [], []>} : vector<8x32xbf16>, vector<32x24xbf16>, vector<8x24xf32> -> vector<8x24xf32>
    %c0_14 = arith.constant 0 : index
    %c0_15 = arith.constant 0 : index
    %c0_16 = arith.constant 0 : index
    %30 = vector.load %arg6[%c0_14, %c0_15, %c0_16] : memref<4x1x24xf32, #tpu.memory_space<vmem>>, vector<1x1x24xf32>
    %31 = vector.shape_cast %30 : vector<1x1x24xf32> to vector<1x24xf32>
    %32 = vector.broadcast %31 : vector<1x24xf32> to vector<8x24xf32>
    %33 = arith.addf %29, %32 : vector<8x24xf32>
    %34 = vector.extract_strided_slice %33 {offsets = [0, 0], sizes = [8, 8], strides = [1, 1]} : vector<8x24xf32> to vector<8x8xf32>
    %35 = arith.truncf %34 : vector<8x8xf32> to vector<8x8xbf16>
    %c0_17 = arith.constant 0 : index
    %c0_18 = arith.constant 0 : index
    %c0_19 = arith.constant 0 : index
    %c0_20 = arith.constant 0 : index
    %36 = vector.load %arg7[%c0_17, %c0_18, %c0_19, %c0_20] : memref<1x4x8x8xbf16, #tpu.memory_space<vmem>>, vector<1x1x8x8xbf16>
    %37 = vector.shape_cast %36 : vector<1x1x8x8xbf16> to vector<8x8xbf16>
    %38 = vector.shape_cast %35 : vector<8x8xbf16> to vector<1x1x8x8xbf16>
    tpu.vector_store %arg7[%c0_17, %c0_18, %c0_19, %c0_20], %38 {strides = array<i32>} : memref<1x4x8x8xbf16, #tpu.memory_space<vmem>>, vector<1x1x8x8xbf16>,
    %39 = vector.extract_strided_slice %33 {offsets = [0, 8], sizes = [8, 8], strides = [1, 1]} : vector<8x24xf32> to vector<8x8xf32>
    %40 = arith.truncf %39 : vector<8x8xf32> to vector<8x8xbf16>
    %c0_21 = arith.constant 0 : index
    %c0_22 = arith.constant 0 : index
    %c0_23 = arith.constant 0 : index
    %c0_24 = arith.constant 0 : index
    %41 = vector.load %arg8[%c0_21, %c0_22, %c0_23, %c0_24] : memref<1x4x8x8xbf16, #tpu.memory_space<vmem>>, vector<1x1x8x8xbf16>
    %42 = vector.shape_cast %41 : vector<1x1x8x8xbf16> to vector<8x8xbf16>
    %43 = vector.shape_cast %40 : vector<8x8xbf16> to vector<1x1x8x8xbf16>
    tpu.vector_store %arg8[%c0_21, %c0_22, %c0_23, %c0_24], %43 {strides = array<i32>} : memref<1x4x8x8xbf16, #tpu.memory_space<vmem>>, vector<1x1x8x8xbf16>,
    %44 = vector.extract_strided_slice %33 {offsets = [0, 16], sizes = [8, 8], strides = [1, 1]} : vector<8x24xf32> to vector<8x8xf32>
    %45 = arith.truncf %44 : vector<8x8xf32> to vector<8x8xbf16>
    %c0_25 = arith.constant 0 : index
    %c0_26 = arith.constant 0 : index
    %c0_27 = arith.constant 0 : index
    %c0_28 = arith.constant 0 : index
    %46 = vector.load %arg9[%c0_25, %c0_26, %c0_27, %c0_28] : memref<1x4x8x8xbf16, #tpu.memory_space<vmem>>, vector<1x1x8x8xbf16>
    %47 = vector.shape_cast %46 : vector<1x1x8x8xbf16> to vector<8x8xbf16>
    %48 = vector.shape_cast %45 : vector<8x8xbf16> to vector<1x1x8x8xbf16>
    tpu.vector_store %arg9[%c0_25, %c0_26, %c0_27, %c0_28], %48 {strides = array<i32>} : memref<1x4x8x8xbf16, #tpu.memory_space<vmem>>, vector<1x1x8x8xbf16>,
    %c1 = arith.constant 1 : index
    %c0_29 = arith.constant 0 : index
    %c0_30 = arith.constant 0 : index
    %49 = vector.load %arg5[%c1, %c0_29, %c0_30] : memref<4x32x24xbf16, #tpu.memory_space<vmem>>, vector<1x32x24xbf16>
    %50 = vector.shape_cast %49 : vector<1x32x24xbf16> to vector<32x24xbf16>
    %cst_31 = arith.constant dense<0.000000e+00> : vector<8x24xf32>
    %51 = tpu.matmul %26, %50, %cst_31 {dimension_numbers = #tpu.dot_dimension_numbers<[1], [0], [0], [1], [0, 0, 1, 1], [], []>} : vector<8x32xbf16>, vector<32x24xbf16>, vector<8x24xf32> -> vector<8x24xf32>
    %c1_32 = arith.constant 1 : index
    %c0_33 = arith.constant 0 : index
    %c0_34 = arith.constant 0 : index
    %52 = vector.load %arg6[%c1_32, %c0_33, %c0_34] : memref<4x1x24xf32, #tpu.memory_space<vmem>>, vector<1x1x24xf32>
    %53 = vector.shape_cast %52 : vector<1x1x24xf32> to vector<1x24xf32>
    %54 = vector.broadcast %53 : vector<1x24xf32> to vector<8x24xf32>
    %55 = arith.addf %51, %54 : vector<8x24xf32>
    %56 = vector.extract_strided_slice %55 {offsets = [0, 0], sizes = [8, 8], strides = [1, 1]} : vector<8x24xf32> to vector<8x8xf32>
    %57 = arith.truncf %56 : vector<8x8xf32> to vector<8x8xbf16>
    %c0_35 = arith.constant 0 : index
    %c1_36 = arith.constant 1 : index
    %c0_37 = arith.constant 0 : index
    %c0_38 = arith.constant 0 : index
    %58 = vector.load %arg7[%c0_35, %c1_36, %c0_37, %c0_38] : memref<1x4x8x8xbf16, #tpu.memory_space<vmem>>, vector<1x1x8x8xbf16>
    %59 = vector.shape_cast %58 : vector<1x1x8x8xbf16> to vector<8x8xbf16>
    %60 = vector.shape_cast %57 : vector<8x8xbf16> to vector<1x1x8x8xbf16>
    tpu.vector_store %arg7[%c0_35, %c1_36, %c0_37, %c0_38], %60 {strides = array<i32>} : memref<1x4x8x8xbf16, #tpu.memory_space<vmem>>, vector<1x1x8x8xbf16>,
    %61 = vector.extract_strided_slice %55 {offsets = [0, 8], sizes = [8, 8], strides = [1, 1]} : vector<8x24xf32> to vector<8x8xf32>
    %62 = arith.truncf %61 : vector<8x8xf32> to vector<8x8xbf16>
    %c0_39 = arith.constant 0 : index
    %c1_40 = arith.constant 1 : index
    %c0_41 = arith.constant 0 : index
    %c0_42 = arith.constant 0 : index
    %63 = vector.load %arg8[%c0_39, %c1_40, %c0_41, %c0_42] : memref<1x4x8x8xbf16, #tpu.memory_space<vmem>>, vector<1x1x8x8xbf16>
    %64 = vector.shape_cast %63 : vector<1x1x8x8xbf16> to vector<8x8xbf16>
    %65 = vector.shape_cast %62 : vector<8x8xbf16> to vector<1x1x8x8xbf16>
    tpu.vector_store %arg8[%c0_39, %c1_40, %c0_41, %c0_42], %65 {strides = array<i32>} : memref<1x4x8x8xbf16, #tpu.memory_space<vmem>>, vector<1x1x8x8xbf16>,
    %66 = vector.extract_strided_slice %55 {offsets = [0, 16], sizes = [8, 8], strides = [1, 1]} : vector<8x24xf32> to vector<8x8xf32>
    %67 = arith.truncf %66 : vector<8x8xf32> to vector<8x8xbf16>
    %c0_43 = arith.constant 0 : index
    %c1_44 = arith.constant 1 : index
    %c0_45 = arith.constant 0 : index
    %c0_46 = arith.constant 0 : index
    %68 = vector.load %arg9[%c0_43, %c1_44, %c0_45, %c0_46] : memref<1x4x8x8xbf16, #tpu.memory_space<vmem>>, vector<1x1x8x8xbf16>
    %69 = vector.shape_cast %68 : vector<1x1x8x8xbf16> to vector<8x8xbf16>
    %70 = vector.shape_cast %67 : vector<8x8xbf16> to vector<1x1x8x8xbf16>
    tpu.vector_store %arg9[%c0_43, %c1_44, %c0_45, %c0_46], %70 {strides = array<i32>} : memref<1x4x8x8xbf16, #tpu.memory_space<vmem>>, vector<1x1x8x8xbf16>,
    %c2 = arith.constant 2 : index
    %c0_47 = arith.constant 0 : index
    %c0_48 = arith.constant 0 : index
    %71 = vector.load %arg5[%c2, %c0_47, %c0_48] : memref<4x32x24xbf16, #tpu.memory_space<vmem>>, vector<1x32x24xbf16>
    %72 = vector.shape_cast %71 : vector<1x32x24xbf16> to vector<32x24xbf16>
    %cst_49 = arith.constant dense<0.000000e+00> : vector<8x24xf32>
    %73 = tpu.matmul %26, %72, %cst_49 {dimension_numbers = #tpu.dot_dimension_numbers<[1], [0], [0], [1], [0, 0, 1, 1], [], []>} : vector<8x32xbf16>, vector<32x24xbf16>, vector<8x24xf32> -> vector<8x24xf32>
    %c2_50 = arith.constant 2 : index
    %c0_51 = arith.constant 0 : index
    %c0_52 = arith.constant 0 : index
    %74 = vector.load %arg6[%c2_50, %c0_51, %c0_52] : memref<4x1x24xf32, #tpu.memory_space<vmem>>, vector<1x1x24xf32>
    %75 = vector.shape_cast %74 : vector<1x1x24xf32> to vector<1x24xf32>
    %76 = vector.broadcast %75 : vector<1x24xf32> to vector<8x24xf32>
    %77 = arith.addf %73, %76 : vector<8x24xf32>
    %78 = vector.extract_strided_slice %77 {offsets = [0, 0], sizes = [8, 8], strides = [1, 1]} : vector<8x24xf32> to vector<8x8xf32>
    %79 = arith.truncf %78 : vector<8x8xf32> to vector<8x8xbf16>
    %c0_53 = arith.constant 0 : index
    %c2_54 = arith.constant 2 : index
    %c0_55 = arith.constant 0 : index
    %c0_56 = arith.constant 0 : index
    %80 = vector.load %arg7[%c0_53, %c2_54, %c0_55, %c0_56] : memref<1x4x8x8xbf16, #tpu.memory_space<vmem>>, vector<1x1x8x8xbf16>
    %81 = vector.shape_cast %80 : vector<1x1x8x8xbf16> to vector<8x8xbf16>
    %82 = vector.shape_cast %79 : vector<8x8xbf16> to vector<1x1x8x8xbf16>
    tpu.vector_store %arg7[%c0_53, %c2_54, %c0_55, %c0_56], %82 {strides = array<i32>} : memref<1x4x8x8xbf16, #tpu.memory_space<vmem>>, vector<1x1x8x8xbf16>,
    %83 = vector.extract_strided_slice %77 {offsets = [0, 8], sizes = [8, 8], strides = [1, 1]} : vector<8x24xf32> to vector<8x8xf32>
    %84 = arith.truncf %83 : vector<8x8xf32> to vector<8x8xbf16>
    %c0_57 = arith.constant 0 : index
    %c2_58 = arith.constant 2 : index
    %c0_59 = arith.constant 0 : index
    %c0_60 = arith.constant 0 : index
    %85 = vector.load %arg8[%c0_57, %c2_58, %c0_59, %c0_60] : memref<1x4x8x8xbf16, #tpu.memory_space<vmem>>, vector<1x1x8x8xbf16>
    %86 = vector.shape_cast %85 : vector<1x1x8x8xbf16> to vector<8x8xbf16>
    %87 = vector.shape_cast %84 : vector<8x8xbf16> to vector<1x1x8x8xbf16>
    tpu.vector_store %arg8[%c0_57, %c2_58, %c0_59, %c0_60], %87 {strides = array<i32>} : memref<1x4x8x8xbf16, #tpu.memory_space<vmem>>, vector<1x1x8x8xbf16>,
    %88 = vector.extract_strided_slice %77 {offsets = [0, 16], sizes = [8, 8], strides = [1, 1]} : vector<8x24xf32> to vector<8x8xf32>
    %89 = arith.truncf %88 : vector<8x8xf32> to vector<8x8xbf16>
    %c0_61 = arith.constant 0 : index
    %c2_62 = arith.constant 2 : index
    %c0_63 = arith.constant 0 : index
    %c0_64 = arith.constant 0 : index
    %90 = vector.load %arg9[%c0_61, %c2_62, %c0_63, %c0_64] : memref<1x4x8x8xbf16, #tpu.memory_space<vmem>>, vector<1x1x8x8xbf16>
    %91 = vector.shape_cast %90 : vector<1x1x8x8xbf16> to vector<8x8xbf16>
    %92 = vector.shape_cast %89 : vector<8x8xbf16> to vector<1x1x8x8xbf16>
    tpu.vector_store %arg9[%c0_61, %c2_62, %c0_63, %c0_64], %92 {strides = array<i32>} : memref<1x4x8x8xbf16, #tpu.memory_space<vmem>>, vector<1x1x8x8xbf16>,
    %c3 = arith.constant 3 : index
    %c0_65 = arith.constant 0 : index
    %c0_66 = arith.constant 0 : index
    %93 = vector.load %arg5[%c3, %c0_65, %c0_66] : memref<4x32x24xbf16, #tpu.memory_space<vmem>>, vector<1x32x24xbf16>
    %94 = vector.shape_cast %93 : vector<1x32x24xbf16> to vector<32x24xbf16>
    %cst_67 = arith.constant dense<0.000000e+00> : vector<8x24xf32>
    %95 = tpu.matmul %26, %94, %cst_67 {dimension_numbers = #tpu.dot_dimension_numbers<[1], [0], [0], [1], [0, 0, 1, 1], [], []>} : vector<8x32xbf16>, vector<32x24xbf16>, vector<8x24xf32> -> vector<8x24xf32>
    %c3_68 = arith.constant 3 : index
    %c0_69 = arith.constant 0 : index
    %c0_70 = arith.constant 0 : index
    %96 = vector.load %arg6[%c3_68, %c0_69, %c0_70] : memref<4x1x24xf32, #tpu.memory_space<vmem>>, vector<1x1x24xf32>
    %97 = vector.shape_cast %96 : vector<1x1x24xf32> to vector<1x24xf32>
    %98 = vector.broadcast %97 : vector<1x24xf32> to vector<8x24xf32>
    %99 = arith.addf %95, %98 : vector<8x24xf32>
    %100 = vector.extract_strided_slice %99 {offsets = [0, 0], sizes = [8, 8], strides = [1, 1]} : vector<8x24xf32> to vector<8x8xf32>
    %101 = arith.truncf %100 : vector<8x8xf32> to vector<8x8xbf16>
    %c0_71 = arith.constant 0 : index
    %c3_72 = arith.constant 3 : index
    %c0_73 = arith.constant 0 : index
    %c0_74 = arith.constant 0 : index
    %102 = vector.load %arg7[%c0_71, %c3_72, %c0_73, %c0_74] : memref<1x4x8x8xbf16, #tpu.memory_space<vmem>>, vector<1x1x8x8xbf16>
    %103 = vector.shape_cast %102 : vector<1x1x8x8xbf16> to vector<8x8xbf16>
    %104 = vector.shape_cast %101 : vector<8x8xbf16> to vector<1x1x8x8xbf16>
    tpu.vector_store %arg7[%c0_71, %c3_72, %c0_73, %c0_74], %104 {strides = array<i32>} : memref<1x4x8x8xbf16, #tpu.memory_space<vmem>>, vector<1x1x8x8xbf16>,
    %105 = vector.extract_strided_slice %99 {offsets = [0, 8], sizes = [8, 8], strides = [1, 1]} : vector<8x24xf32> to vector<8x8xf32>
    %106 = arith.truncf %105 : vector<8x8xf32> to vector<8x8xbf16>
    %c0_75 = arith.constant 0 : index
    %c3_76 = arith.constant 3 : index
    %c0_77 = arith.constant 0 : index
    %c0_78 = arith.constant 0 : index
    %107 = vector.load %arg8[%c0_75, %c3_76, %c0_77, %c0_78] : memref<1x4x8x8xbf16, #tpu.memory_space<vmem>>, vector<1x1x8x8xbf16>
    %108 = vector.shape_cast %107 : vector<1x1x8x8xbf16> to vector<8x8xbf16>
    %109 = vector.shape_cast %106 : vector<8x8xbf16> to vector<1x1x8x8xbf16>
    tpu.vector_store %arg8[%c0_75, %c3_76, %c0_77, %c0_78], %109 {strides = array<i32>} : memref<1x4x8x8xbf16, #tpu.memory_space<vmem>>, vector<1x1x8x8xbf16>,
    %110 = vector.extract_strided_slice %99 {offsets = [0, 16], sizes = [8, 8], strides = [1, 1]} : vector<8x24xf32> to vector<8x8xf32>
    %111 = arith.truncf %110 : vector<8x8xf32> to vector<8x8xbf16>
    %c0_79 = arith.constant 0 : index
    %c3_80 = arith.constant 3 : index
    %c0_81 = arith.constant 0 : index
    %c0_82 = arith.constant 0 : index
    %112 = vector.load %arg9[%c0_79, %c3_80, %c0_81, %c0_82] : memref<1x4x8x8xbf16, #tpu.memory_space<vmem>>, vector<1x1x8x8xbf16>
    %113 = vector.shape_cast %112 : vector<1x1x8x8xbf16> to vector<8x8xbf16>
    %114 = vector.shape_cast %111 : vector<8x8xbf16> to vector<1x1x8x8xbf16>
    tpu.vector_store %arg9[%c0_79, %c3_80, %c0_81, %c0_82], %114 {strides = array<i32>} : memref<1x4x8x8xbf16, #tpu.memory_space<vmem>>, vector<1x1x8x8xbf16>,
    return
  }
  func.func @transform_0(%arg0: i32, %arg1: i32) -> (i32, i32, i32) {
    %c0_i32 = arith.constant 0 : i32
    %c0_i32_0 = arith.constant 0 : i32
    return %arg0, %arg1, %c0_i32 : i32, i32, i32
  }
  func.func @transform_1(%arg0: i32, %arg1: i32) -> (i32, i32) {
    %c0_i32 = arith.constant 0 : i32
    %c0_i32_0 = arith.constant 0 : i32
    %c0_i32_1 = arith.constant 0 : i32
    return %c0_i32, %c0_i32_0 : i32, i32
  }
  func.func @transform_2(%arg0: i32, %arg1: i32) -> (i32, i32) {
    %c0_i32 = arith.constant 0 : i32
    %c0_i32_0 = arith.constant 0 : i32
    %c0_i32_1 = arith.constant 0 : i32
    return %c0_i32, %c0_i32_0 : i32, i32
  }
  func.func @transform_3(%arg0: i32, %arg1: i32) -> (i32, i32, i32) {
    %c0_i32 = arith.constant 0 : i32
    %c0_i32_0 = arith.constant 0 : i32
    %c0_i32_1 = arith.constant 0 : i32
    %c0_i32_2 = arith.constant 0 : i32
    return %c0_i32, %c0_i32_0, %c0_i32_1 : i32, i32, i32
  }
  func.func @transform_4(%arg0: i32, %arg1: i32) -> (i32, i32, i32) {
    %c0_i32 = arith.constant 0 : i32
    %c0_i32_0 = arith.constant 0 : i32
    %c0_i32_1 = arith.constant 0 : i32
    %c0_i32_2 = arith.constant 0 : i32
    return %c0_i32, %c0_i32_0, %c0_i32_1 : i32, i32, i32
  }
  func.func @transform_5(%arg0: i32, %arg1: i32) -> (i32, i32, i32, i32) {
    %c0_i32 = arith.constant 0 : i32
    %c0_i32_0 = arith.constant 0 : i32
    %c0_i32_1 = arith.constant 0 : i32
    return %arg0, %c0_i32, %arg1, %c0_i32_0 : i32, i32, i32, i32
  }
  func.func @transform_6(%arg0: i32, %arg1: i32) -> (i32, i32, i32, i32) {
    %c0_i32 = arith.constant 0 : i32
    %c0_i32_0 = arith.constant 0 : i32
    %c0_i32_1 = arith.constant 0 : i32
    return %arg0, %c0_i32, %arg1, %c0_i32_0 : i32, i32, i32, i32
  }
  func.func @transform_7(%arg0: i32, %arg1: i32) -> (i32, i32, i32, i32) {
    %c0_i32 = arith.constant 0 : i32
    %c0_i32_0 = arith.constant 0 : i32
    %c0_i32_1 = arith.constant 0 : i32
    return %arg0, %c0_i32, %arg1, %c0_i32_0 : i32, i32, i32, i32
  }
}

module attributes {stable_mosaic.version = 11 : i64} {
  func.func @_qkv_kernel(%arg0: i32, %arg1: i32, %arg2: memref<1x8x32xf32, #tpu.memory_space<vmem>>, %arg3: memref<1x32xf32, #tpu.memory_space<vmem>>, %arg4: memref<1x32xf32, #tpu.memory_space<vmem>>, %arg5: memref<4x32x24xbf16, #tpu.memory_space<vmem>>, %arg6: memref<4x1x24xf32, #tpu.memory_space<vmem>>, %arg7: memref<1x4x8x8xbf16, #tpu.memory_space<vmem>>, %arg8: memref<1x4x8x8xbf16, #tpu.memory_space<vmem>>, %arg9: memref<1x4x8x8xbf16, #tpu.memory_space<vmem>>) attributes {dimension_semantics = [#tpu.dimension_semantics<parallel>, #tpu.dimension_semantics<parallel>], iteration_bounds = array<i64: 2, 1>, scalar_prefetch = 0 : i64, scratch_operands = 0 : i64, tpu.core_type = #tpu.core_type<tc>, window_params = [{transform_indices = @transform_0, window_bounds = array<i64: 1, 8, 32>}, {pipeline_mode = #tpu.pipeline_mode<synchronous>, transform_indices = @transform_1, window_bounds = array<i64: 1, 32>}, {pipeline_mode = #tpu.pipeline_mode<synchronous>, transform_indices = @transform_2, window_bounds = array<i64: 1, 32>}, {pipeline_mode = #tpu.pipeline_mode<synchronous>, transform_indices = @transform_3, window_bounds = array<i64: 4, 32, 24>}, {pipeline_mode = #tpu.pipeline_mode<synchronous>, transform_indices = @transform_4, window_bounds = array<i64: 4, 1, 24>}, {transform_indices = @transform_5, window_bounds = array<i64: 1, 4, 8, 8>}, {transform_indices = @transform_6, window_bounds = array<i64: 1, 4, 8, 8>}, {transform_indices = @transform_7, window_bounds = array<i64: 1, 4, 8, 8>}]} {
    %c0 = arith.constant 0 : index
    %c0_0 = arith.constant 0 : index
    %c0_1 = arith.constant 0 : index
    %0 = vector.load %arg2[%c0, %c0_0, %c0_1] : memref<1x8x32xf32, #tpu.memory_space<vmem>>, vector<1x8x32xf32>
    %1 = vector.shape_cast %0 : vector<1x8x32xf32> to vector<8x32xf32>
    %c0_2 = arith.constant 0 : index
    %c0_3 = arith.constant 0 : index
    %2 = vector.load %arg3[%c0_2, %c0_3] : memref<1x32xf32, #tpu.memory_space<vmem>>, vector<1x32xf32>
    %c0_4 = arith.constant 0 : index
    %c0_5 = arith.constant 0 : index
    %3 = vector.load %arg4[%c0_4, %c0_5] : memref<1x32xf32, #tpu.memory_space<vmem>>, vector<1x32xf32>
    %cst = arith.constant dense<0.000000e+00> : vector<8xf32>
    %4 = vector.multi_reduction <add>, %1, %cst [1] : vector<8x32xf32> to vector<8xf32>
    %5 = vector.shape_cast %4 : vector<8xf32> to vector<8x1xf32>
    %cst_6 = arith.constant 3.200000e+01 : f32
    %6 = vector.broadcast %cst_6 : f32 to vector<8x1xf32>
    %7 = arith.divf %5, %6 : vector<8x1xf32>
    %8 = vector.broadcast %7 : vector<8x1xf32> to vector<8x32xf32>
    %9 = arith.subf %1, %8 : vector<8x32xf32>
    %10 = arith.mulf %9, %9 : vector<8x32xf32>
    %cst_7 = arith.constant dense<0.000000e+00> : vector<8xf32>
    %11 = vector.multi_reduction <add>, %10, %cst_7 [1] : vector<8x32xf32> to vector<8xf32>
    %12 = vector.shape_cast %11 : vector<8xf32> to vector<8x1xf32>
    %cst_8 = arith.constant 3.200000e+01 : f32
    %13 = vector.broadcast %cst_8 : f32 to vector<8x1xf32>
    %14 = arith.divf %12, %13 : vector<8x1xf32>
    %15 = vector.broadcast %7 : vector<8x1xf32> to vector<8x32xf32>
    %16 = arith.subf %1, %15 : vector<8x32xf32>
    %cst_9 = arith.constant 9.99999974E-6 : f32
    %17 = vector.broadcast %cst_9 : f32 to vector<8x1xf32>
    %18 = arith.addf %14, %17 : vector<8x1xf32>
    %19 = math.rsqrt %18 : vector<8x1xf32>
    %20 = vector.broadcast %19 : vector<8x1xf32> to vector<8x32xf32>
    %21 = arith.mulf %16, %20 : vector<8x32xf32>
    %22 = vector.broadcast %2 : vector<1x32xf32> to vector<8x32xf32>
    %23 = arith.mulf %21, %22 : vector<8x32xf32>
    %24 = vector.broadcast %3 : vector<1x32xf32> to vector<8x32xf32>
    %25 = arith.addf %23, %24 : vector<8x32xf32>
    %26 = arith.truncf %25 : vector<8x32xf32> to vector<8x32xbf16>
    %c0_10 = arith.constant 0 : index
    %c0_11 = arith.constant 0 : index
    %c0_12 = arith.constant 0 : index
    %27 = vector.load %arg5[%c0_10, %c0_11, %c0_12] : memref<4x32x24xbf16, #tpu.memory_space<vmem>>, vector<1x32x24xbf16>
    %28 = vector.shape_cast %27 : vector<1x32x24xbf16> to vector<32x24xbf16>
    %cst_13 = arith.constant dense<0.000000e+00> : vector<8x24xf32>
    %29 = tpu.matmul %26, %28, %cst_13 {dimension_numbers = #tpu.dot_dimension_numbers<[1], [0], [0], [1], [0, 0, 1, 1], [], []>} : vector<8x32xbf16>, vector<32x24xbf16>, vector<8x24xf32> -> vector<8x24xf32>
    %c0_14 = arith.constant 0 : index
    %c0_15 = arith.constant 0 : index
    %c0_16 = arith.constant 0 : index
    %30 = vector.load %arg6[%c0_14, %c0_15, %c0_16] : memref<4x1x24xf32, #tpu.memory_space<vmem>>, vector<1x1x24xf32>
    %31 = vector.shape_cast %30 : vector<1x1x24xf32> to vector<1x24xf32>
    %32 = vector.broadcast %31 : vector<1x24xf32> to vector<8x24xf32>
    %33 = arith.addf %29, %32 : vector<8x24xf32>
    %34 = vector.extract_strided_slice %33 {offsets = [0, 0], sizes = [8, 8], strides = [1, 1]} : vector<8x24xf32> to vector<8x8xf32>
    %35 = arith.truncf %34 : vector<8x8xf32> to vector<8x8xbf16>
    %c0_17 = arith.constant 0 : index
    %c0_18 = arith.constant 0 : index
    %c0_19 = arith.constant 0 : index
    %c0_20 = arith.constant 0 : index
    %36 = vector.load %arg7[%c0_17, %c0_18, %c0_19, %c0_20] : memref<1x4x8x8xbf16, #tpu.memory_space<vmem>>, vector<1x1x8x8xbf16>
    %37 = vector.shape_cast %36 : vector<1x1x8x8xbf16> to vector<8x8xbf16>
    %38 = vector.shape_cast %35 : vector<8x8xbf16> to vector<1x1x8x8xbf16>
    tpu.vector_store %arg7[%c0_17, %c0_18, %c0_19, %c0_20], %38 {strides = array<i32>} : memref<1x4x8x8xbf16, #tpu.memory_space<vmem>>, vector<1x1x8x8xbf16>,
    %39 = vector.extract_strided_slice %33 {offsets = [0, 8], sizes = [8, 8], strides = [1, 1]} : vector<8x24xf32> to vector<8x8xf32>
    %40 = arith.truncf %39 : vector<8x8xf32> to vector<8x8xbf16>
    %c0_21 = arith.constant 0 : index
    %c0_22 = arith.constant 0 : index
    %c0_23 = arith.constant 0 : index
    %c0_24 = arith.constant 0 : index
    %41 = vector.load %arg8[%c0_21, %c0_22, %c0_23, %c0_24] : memref<1x4x8x8xbf16, #tpu.memory_space<vmem>>, vector<1x1x8x8xbf16>
    %42 = vector.shape_cast %41 : vector<1x1x8x8xbf16> to vector<8x8xbf16>
    %43 = vector.shape_cast %40 : vector<8x8xbf16> to vector<1x1x8x8xbf16>
    tpu.vector_store %arg8[%c0_21, %c0_22, %c0_23, %c0_24], %43 {strides = array<i32>} : memref<1x4x8x8xbf16, #tpu.memory_space<vmem>>, vector<1x1x8x8xbf16>,
    %44 = vector.extract_strided_slice %33 {offsets = [0, 16], sizes = [8, 8], strides = [1, 1]} : vector<8x24xf32> to vector<8x8xf32>
    %45 = arith.truncf %44 : vector<8x8xf32> to vector<8x8xbf16>
    %c0_25 = arith.constant 0 : index
    %c0_26 = arith.constant 0 : index
    %c0_27 = arith.constant 0 : index
    %c0_28 = arith.constant 0 : index
    %46 = vector.load %arg9[%c0_25, %c0_26, %c0_27, %c0_28] : memref<1x4x8x8xbf16, #tpu.memory_space<vmem>>, vector<1x1x8x8xbf16>
    %47 = vector.shape_cast %46 : vector<1x1x8x8xbf16> to vector<8x8xbf16>
    %48 = vector.shape_cast %45 : vector<8x8xbf16> to vector<1x1x8x8xbf16>
    tpu.vector_store %arg9[%c0_25, %c0_26, %c0_27, %c0_28], %48 {strides = array<i32>} : memref<1x4x8x8xbf16, #tpu.memory_space<vmem>>, vector<1x1x8x8xbf16>,
    %c1 = arith.constant 1 : index
    %c0_29 = arith.constant 0 : index
    %c0_30 = arith.constant 0 : index
    %49 = vector.load %arg5[%c1, %c0_29, %c0_30] : memref<4x32x24xbf16, #tpu.memory_space<vmem>>, vector<1x32x24xbf16>
    %50 = vector.shape_cast %49 : vector<1x32x24xbf16> to vector<32x24xbf16>
    %cst_31 = arith.constant dense<0.000000e+00> : vector<8x24xf32>
    %51 = tpu.matmul %26, %50, %cst_31 {dimension_numbers = #tpu.dot_dimension_numbers<[1], [0], [0], [1], [0, 0, 1, 1], [], []>} : vector<8x32xbf16>, vector<32x24xbf16>, vector<8x24xf32> -> vector<8x24xf32>
    %c1_32 = arith.constant 1 : index
    %c0_33 = arith.constant 0 : index
    %c0_34 = arith.constant 0 : index
    %52 = vector.load %arg6[%c1_32, %c0_33, %c0_34] : memref<4x1x24xf32, #tpu.memory_space<vmem>>, vector<1x1x24xf32>
    %53 = vector.shape_cast %52 : vector<1x1x24xf32> to vector<1x24xf32>
    %54 = vector.broadcast %53 : vector<1x24xf32> to vector<8x24xf32>
    %55 = arith.addf %51, %54 : vector<8x24xf32>
    %56 = vector.extract_strided_slice %55 {offsets = [0, 0], sizes = [8, 8], strides = [1, 1]} : vector<8x24xf32> to vector<8x8xf32>
    %57 = arith.truncf %56 : vector<8x8xf32> to vector<8x8xbf16>
    %c0_35 = arith.constant 0 : index
    %c1_36 = arith.constant 1 : index
    %c0_37 = arith.constant 0 : index
    %c0_38 = arith.constant 0 : index
    %58 = vector.load %arg7[%c0_35, %c1_36, %c0_37, %c0_38] : memref<1x4x8x8xbf16, #tpu.memory_space<vmem>>, vector<1x1x8x8xbf16>
    %59 = vector.shape_cast %58 : vector<1x1x8x8xbf16> to vector<8x8xbf16>
    %60 = vector.shape_cast %57 : vector<8x8xbf16> to vector<1x1x8x8xbf16>
    tpu.vector_store %arg7[%c0_35, %c1_36, %c0_37, %c0_38], %60 {strides = array<i32>} : memref<1x4x8x8xbf16, #tpu.memory_space<vmem>>, vector<1x1x8x8xbf16>,
    %61 = vector.extract_strided_slice %55 {offsets = [0, 8], sizes = [8, 8], strides = [1, 1]} : vector<8x24xf32> to vector<8x8xf32>
    %62 = arith.truncf %61 : vector<8x8xf32> to vector<8x8xbf16>
    %c0_39 = arith.constant 0 : index
    %c1_40 = arith.constant 1 : index
    %c0_41 = arith.constant 0 : index
    %c0_42 = arith.constant 0 : index
    %63 = vector.load %arg8[%c0_39, %c1_40, %c0_41, %c0_42] : memref<1x4x8x8xbf16, #tpu.memory_space<vmem>>, vector<1x1x8x8xbf16>
    %64 = vector.shape_cast %63 : vector<1x1x8x8xbf16> to vector<8x8xbf16>
    %65 = vector.shape_cast %62 : vector<8x8xbf16> to vector<1x1x8x8xbf16>
    tpu.vector_store %arg8[%c0_39, %c1_40, %c0_41, %c0_42], %65 {strides = array<i32>} : memref<1x4x8x8xbf16, #tpu.memory_space<vmem>>, vector<1x1x8x8xbf16>,
    %66 = vector.extract_strided_slice %55 {offsets = [0, 16], sizes = [8, 8], strides = [1, 1]} : vector<8x24xf32> to vector<8x8xf32>
    %67 = arith.truncf %66 : vector<8x8xf32> to vector<8x8xbf16>
    %c0_43 = arith.constant 0 : index
    %c1_44 = arith.constant 1 : index
    %c0_45 = arith.constant 0 : index
    %c0_46 = arith.constant 0 : index
    %68 = vector.load %arg9[%c0_43, %c1_44, %c0_45, %c0_46] : memref<1x4x8x8xbf16, #tpu.memory_space<vmem>>, vector<1x1x8x8xbf16>
    %69 = vector.shape_cast %68 : vector<1x1x8x8xbf16> to vector<8x8xbf16>
    %70 = vector.shape_cast %67 : vector<8x8xbf16> to vector<1x1x8x8xbf16>
    tpu.vector_store %arg9[%c0_43, %c1_44, %c0_45, %c0_46], %70 {strides = array<i32>} : memref<1x4x8x8xbf16, #tpu.memory_space<vmem>>, vector<1x1x8x8xbf16>,
    %c2 = arith.constant 2 : index
    %c0_47 = arith.constant 0 : index
    %c0_48 = arith.constant 0 : index
    %71 = vector.load %arg5[%c2, %c0_47, %c0_48] : memref<4x32x24xbf16, #tpu.memory_space<vmem>>, vector<1x32x24xbf16>
    %72 = vector.shape_cast %71 : vector<1x32x24xbf16> to vector<32x24xbf16>
    %cst_49 = arith.constant dense<0.000000e+00> : vector<8x24xf32>
    %73 = tpu.matmul %26, %72, %cst_49 {dimension_numbers = #tpu.dot_dimension_numbers<[1], [0], [0], [1], [0, 0, 1, 1], [], []>} : vector<8x32xbf16>, vector<32x24xbf16>, vector<8x24xf32> -> vector<8x24xf32>
    %c2_50 = arith.constant 2 : index
    %c0_51 = arith.constant 0 : index
    %c0_52 = arith.constant 0 : index
    %74 = vector.load %arg6[%c2_50, %c0_51, %c0_52] : memref<4x1x24xf32, #tpu.memory_space<vmem>>, vector<1x1x24xf32>
    %75 = vector.shape_cast %74 : vector<1x1x24xf32> to vector<1x24xf32>
    %76 = vector.broadcast %75 : vector<1x24xf32> to vector<8x24xf32>
    %77 = arith.addf %73, %76 : vector<8x24xf32>
    %78 = vector.extract_strided_slice %77 {offsets = [0, 0], sizes = [8, 8], strides = [1, 1]} : vector<8x24xf32> to vector<8x8xf32>
    %79 = arith.truncf %78 : vector<8x8xf32> to vector<8x8xbf16>
    %c0_53 = arith.constant 0 : index
    %c2_54 = arith.constant 2 : index
    %c0_55 = arith.constant 0 : index
    %c0_56 = arith.constant 0 : index
    %80 = vector.load %arg7[%c0_53, %c2_54, %c0_55, %c0_56] : memref<1x4x8x8xbf16, #tpu.memory_space<vmem>>, vector<1x1x8x8xbf16>
    %81 = vector.shape_cast %80 : vector<1x1x8x8xbf16> to vector<8x8xbf16>
    %82 = vector.shape_cast %79 : vector<8x8xbf16> to vector<1x1x8x8xbf16>
    tpu.vector_store %arg7[%c0_53, %c2_54, %c0_55, %c0_56], %82 {strides = array<i32>} : memref<1x4x8x8xbf16, #tpu.memory_space<vmem>>, vector<1x1x8x8xbf16>,
    %83 = vector.extract_strided_slice %77 {offsets = [0, 8], sizes = [8, 8], strides = [1, 1]} : vector<8x24xf32> to vector<8x8xf32>
    %84 = arith.truncf %83 : vector<8x8xf32> to vector<8x8xbf16>
    %c0_57 = arith.constant 0 : index
    %c2_58 = arith.constant 2 : index
    %c0_59 = arith.constant 0 : index
    %c0_60 = arith.constant 0 : index
    %85 = vector.load %arg8[%c0_57, %c2_58, %c0_59, %c0_60] : memref<1x4x8x8xbf16, #tpu.memory_space<vmem>>, vector<1x1x8x8xbf16>
    %86 = vector.shape_cast %85 : vector<1x1x8x8xbf16> to vector<8x8xbf16>
    %87 = vector.shape_cast %84 : vector<8x8xbf16> to vector<1x1x8x8xbf16>
    tpu.vector_store %arg8[%c0_57, %c2_58, %c0_59, %c0_60], %87 {strides = array<i32>} : memref<1x4x8x8xbf16, #tpu.memory_space<vmem>>, vector<1x1x8x8xbf16>,
    %88 = vector.extract_strided_slice %77 {offsets = [0, 16], sizes = [8, 8], strides = [1, 1]} : vector<8x24xf32> to vector<8x8xf32>
    %89 = arith.truncf %88 : vector<8x8xf32> to vector<8x8xbf16>
    %c0_61 = arith.constant 0 : index
    %c2_62 = arith.constant 2 : index
    %c0_63 = arith.constant 0 : index
    %c0_64 = arith.constant 0 : index
    %90 = vector.load %arg9[%c0_61, %c2_62, %c0_63, %c0_64] : memref<1x4x8x8xbf16, #tpu.memory_space<vmem>>, vector<1x1x8x8xbf16>
    %91 = vector.shape_cast %90 : vector<1x1x8x8xbf16> to vector<8x8xbf16>
    %92 = vector.shape_cast %89 : vector<8x8xbf16> to vector<1x1x8x8xbf16>
    tpu.vector_store %arg9[%c0_61, %c2_62, %c0_63, %c0_64], %92 {strides = array<i32>} : memref<1x4x8x8xbf16, #tpu.memory_space<vmem>>, vector<1x1x8x8xbf16>,
    %c3 = arith.constant 3 : index
    %c0_65 = arith.constant 0 : index
    %c0_66 = arith.constant 0 : index
    %93 = vector.load %arg5[%c3, %c0_65, %c0_66] : memref<4x32x24xbf16, #tpu.memory_space<vmem>>, vector<1x32x24xbf16>
    %94 = vector.shape_cast %93 : vector<1x32x24xbf16> to vector<32x24xbf16>
    %cst_67 = arith.constant dense<0.000000e+00> : vector<8x24xf32>
    %95 = tpu.matmul %26, %94, %cst_67 {dimension_numbers = #tpu.dot_dimension_numbers<[1], [0], [0], [1], [0, 0, 1, 1], [], []>} : vector<8x32xbf16>, vector<32x24xbf16>, vector<8x24xf32> -> vector<8x24xf32>
    %c3_68 = arith.constant 3 : index
    %c0_69 = arith.constant 0 : index
    %c0_70 = arith.constant 0 : index
    %96 = vector.load %arg6[%c3_68, %c0_69, %c0_70] : memref<4x1x24xf32, #tpu.memory_space<vmem>>, vector<1x1x24xf32>
    %97 = vector.shape_cast %96 : vector<1x1x24xf32> to vector<1x24xf32>
    %98 = vector.broadcast %97 : vector<1x24xf32> to vector<8x24xf32>
    %99 = arith.addf %95, %98 : vector<8x24xf32>
    %100 = vector.extract_strided_slice %99 {offsets = [0, 0], sizes = [8, 8], strides = [1, 1]} : vector<8x24xf32> to vector<8x8xf32>
    %101 = arith.truncf %100 : vector<8x8xf32> to vector<8x8xbf16>
    %c0_71 = arith.constant 0 : index
    %c3_72 = arith.constant 3 : index
    %c0_73 = arith.constant 0 : index
    %c0_74 = arith.constant 0 : index
    %102 = vector.load %arg7[%c0_71, %c3_72, %c0_73, %c0_74] : memref<1x4x8x8xbf16, #tpu.memory_space<vmem>>, vector<1x1x8x8xbf16>
    %103 = vector.shape_cast %102 : vector<1x1x8x8xbf16> to vector<8x8xbf16>
    %104 = vector.shape_cast %101 : vector<8x8xbf16> to vector<1x1x8x8xbf16>
    tpu.vector_store %arg7[%c0_71, %c3_72, %c0_73, %c0_74], %104 {strides = array<i32>} : memref<1x4x8x8xbf16, #tpu.memory_space<vmem>>, vector<1x1x8x8xbf16>,
    %105 = vector.extract_strided_slice %99 {offsets = [0, 8], sizes = [8, 8], strides = [1, 1]} : vector<8x24xf32> to vector<8x8xf32>
    %106 = arith.truncf %105 : vector<8x8xf32> to vector<8x8xbf16>
    %c0_75 = arith.constant 0 : index
    %c3_76 = arith.constant 3 : index
    %c0_77 = arith.constant 0 : index
    %c0_78 = arith.constant 0 : index
    %107 = vector.load %arg8[%c0_75, %c3_76, %c0_77, %c0_78] : memref<1x4x8x8xbf16, #tpu.memory_space<vmem>>, vector<1x1x8x8xbf16>
    %108 = vector.shape_cast %107 : vector<1x1x8x8xbf16> to vector<8x8xbf16>
    %109 = vector.shape_cast %106 : vector<8x8xbf16> to vector<1x1x8x8xbf16>
    tpu.vector_store %arg8[%c0_75, %c3_76, %c0_77, %c0_78], %109 {strides = array<i32>} : memref<1x4x8x8xbf16, #tpu.memory_space<vmem>>, vector<1x1x8x8xbf16>,
    %110 = vector.extract_strided_slice %99 {offsets = [0, 16], sizes = [8, 8], strides = [1, 1]} : vector<8x24xf32> to vector<8x8xf32>
    %111 = arith.truncf %110 : vector<8x8xf32> to vector<8x8xbf16>
    %c0_79 = arith.constant 0 : index
    %c3_80 = arith.constant 3 : index
    %c0_81 = arith.constant 0 : index
    %c0_82 = arith.constant 0 : index
    %112 = vector.load %arg9[%c0_79, %c3_80, %c0_81, %c0_82] : memref<1x4x8x8xbf16, #tpu.memory_space<vmem>>, vector<1x1x8x8xbf16>
    %113 = vector.shape_cast %112 : vector<1x1x8x8xbf16> to vector<8x8xbf16>
    %114 = vector.shape_cast %111 : vector<8x8xbf16> to vector<1x1x8x8xbf16>
    tpu.vector_store %arg9[%c0_79, %c3_80, %c0_81, %c0_82], %114 {strides = array<i32>} : memref<1x4x8x8xbf16, #tpu.memory_space<vmem>>, vector<1x1x8x8xbf16>,
    return
  }
  func.func @transform_0(%arg0: i32, %arg1: i32) -> (i32, i32, i32) {
    %c0_i32 = arith.constant 0 : i32
    %c0_i32_0 = arith.constant 0 : i32
    return %arg0, %arg1, %c0_i32 : i32, i32, i32
  }
  func.func @transform_1(%arg0: i32, %arg1: i32) -> (i32, i32) {
    %c0_i32 = arith.constant 0 : i32
    %c0_i32_0 = arith.constant 0 : i32
    %c0_i32_1 = arith.constant 0 : i32
    return %c0_i32, %c0_i32_0 : i32, i32
  }
  func.func @transform_2(%arg0: i32, %arg1: i32) -> (i32, i32) {
    %c0_i32 = arith.constant 0 : i32
    %c0_i32_0 = arith.constant 0 : i32
    %c0_i32_1 = arith.constant 0 : i32
    return %c0_i32, %c0_i32_0 : i32, i32
  }
  func.func @transform_3(%arg0: i32, %arg1: i32) -> (i32, i32, i32) {
    %c0_i32 = arith.constant 0 : i32
    %c0_i32_0 = arith.constant 0 : i32
    %c0_i32_1 = arith.constant 0 : i32
    %c0_i32_2 = arith.constant 0 : i32
    return %c0_i32, %c0_i32_0, %c0_i32_1 : i32, i32, i32
  }
  func.func @transform_4(%arg0: i32, %arg1: i32) -> (i32, i32, i32) {
    %c0_i32 = arith.constant 0 : i32
    %c0_i32_0 = arith.constant 0 : i32
    %c0_i32_1 = arith.constant 0 : i32
    %c0_i32_2 = arith.constant 0 : i32
    return %c0_i32, %c0_i32_0, %c0_i32_1 : i32, i32, i32
  }
  func.func @transform_5(%arg0: i32, %arg1: i32) -> (i32, i32, i32, i32) {
    %c0_i32 = arith.constant 0 : i32
    %c0_i32_0 = arith.constant 0 : i32
    %c0_i32_1 = arith.constant 0 : i32
    return %arg0, %c0_i32, %arg1, %c0_i32_0 : i32, i32, i32, i32
  }
  func.func @transform_6(%arg0: i32, %arg1: i32) -> (i32, i32, i32, i32) {
    %c0_i32 = arith.constant 0 : i32
    %c0_i32_0 = arith.constant 0 : i32
    %c0_i32_1 = arith.constant 0 : i32
    return %arg0, %c0_i32, %arg1, %c0_i32_0 : i32, i32, i32, i32
  }
  func.func @transform_7(%arg0: i32, %arg1: i32) -> (i32, i32, i32, i32) {
    %c0_i32 = arith.constant 0 : i32
    %c0_i32_0 = arith.constant 0 : i32
    %c0_i32_1 = arith.constant 0 : i32
    return %arg0, %c0_i32, %arg1, %c0_i32_0 : i32, i32, i32, i32
  }
}

</mosaic_0001>

<bundles_post_ra>
// kernel: tpu_custom_call.1
= control target key start
LH: loop header
LB: loop body
LE: loop exit
PB: predicated region body
PF: predicated region fallthrough
CT: control target
= control target key end

     0   :  { %13 = vsyncpa [#allocation3], 0  ;;  %s1552_s0 = inlined_call_operand.vmem [shape: f32[2,8,32], index: 0, kind: input, shape index: {}]   ;;  %s1553_s1 = inlined_call_operand.vmem [shape: f32[1,32], index: 1, kind: input, shape index: {}]   ;;  %s1554_s2 = inlined_call_operand.vmem [shape: f32[1,32], index: 2, kind: input, shape index: {}]   ;;  %s1555_s3 = inlined_call_operand.vmem [shape: bf16[4,32,24], index: 3, kind: input, shape index: {}]   ;;  %s1556_s4 = inlined_call_operand.vmem [shape: f32[4,1,24], index: 4, kind: input, shape index: {}]   ;;  %s1557_s5 = inlined_call_operand.hbm [shape: bf16[2,4,8,8], index: 5, kind: output, shape index: {0}]   ;;  %s1558_s6 = inlined_call_operand.hbm [shape: bf16[2,4,8,8], index: 6, kind: output, shape index: {1}]   ;;  %s1559_s7 = inlined_call_operand.hbm [shape: bf16[2,4,8,8], index: 7, kind: output, shape index: {2}]  }
   0x1   :  { %15 = vsyncpa [#allocation3 + $0x1], 0 }
   0x2   :  { %16 = vsyncpa [#allocation5], 0 }
   0x3   :  { %18 = vsyncpa [#allocation5 + $0x1], 0  ;;  %s1264_s24 = smov 0   ;;  %s1266_s25 = smov 0  }
   0x4   :  { %s1268_s26 = smov 0   ;;  %s1270_s27 = smov 0  }
   0x5   :  { %s1272_s28 = smov 0   ;;  %s1274_s29 = smov 0  }
   0x6 LB: > { %s1561_s30 = sadd.s32 4294967295, %s1213_s29   ;;  %s1560_s8 = sadd.s32 4294967294, %s1213_s29   ;;  %s1213_s29 = sphi %s1274_s29, %s24_s29   ;;  %s1209_s28 = sphi %s1272_s28, %s1578_s28   ;;  %s1205_s27 = sphi %s1270_s27, %s1577_s27   ;;  %s1201_s26 = sphi %s1268_s26, %s1576_s26   ;;  %s1197_s25 = sphi %s1266_s25, %s1575_s25   ;;  %s1193_s24 = sphi %s1264_s24, %s1574_s24  }
   0x7   : > { %s36_s9 = sadd.s32 1, %s1209_s28  ;;  %s157_s10 = sadd.s32 1, %s1201_s26 }
   0x8   : > { %p38_p0 = scmp.ge.s32.totalorder %s36_s9, 2  ;;  %p167_p1 = scmp.ne.s32.totalorder %s1201_s26, %s1197_s25 }
   0x9   : > { %p168_p2 = scmp.eq.s32.totalorder %s1561_s30, 1  ;;  %p173_p3 = scmp.ne.s32.totalorder %s1197_s25, %s1193_s24 }
   0xa   : > { %s1580_s9 = smov (%p38_p0, %s36_s9), 0  ;;  %p174_p5 = scmp.eq.s32.totalorder %s1560_s8, 1 }
   0xb   : > { %p1306_p4 = por %p168_p2, %p167_p1  ;;  %s152_s12 = ssub.s32 %s1209_s28, %s1580_s9 }
   0xc   : > { %p881_p6 = scmp.ge.s32.totalorder %s1213_s29, 1  ;;  %p155_p7 = scmp.eq.s32.totalorder %s152_s12, 0 }
   0xd   : > { %p1315_p8 = por %p174_p5, %p173_p3  ;;  %p270_p9 = scmp.lt.s32.totalorder %s1213_s29, 3 }
   0xe   : > { %s1321_s14 = scalar_select %p155_p7, %s1201_s26, %s157_s10  }
   0xf   : > { %p271_p10 = pnand %p881_p6, %p270_p9 }
  0x10   : > { %p314_p11 = scmp.lt.s32.totalorder (!%p271_p10), %s1205_s27, 1  ;;  %vm325_vm0 = vcmask (!%p271_p10), 261120   ;;  %v1065_v7 = vld [vmem:[%s1555_s3] sm:$0xff] (!%p271_p10)   ;;  %v1066_v8 = vld [vmem:[%s1555_s3 + $0x10] sm:$0xff] (!%p271_p10)   ;;  %v1215_v9 = vmov (!%p271_p10), 0.0   ;;  %v1067_v10 = vld [vmem:[%s1555_s3 + $0x8] sm:$0xff] (!%p271_p10)  }
  0x11   : > { %274 = sbr.rel (%p271_p10) target bundleno = 739 (0x2e3), region = 40  ;;  %962 = vmatprep.subr.bf16.mxu0 (!%p271_p10), %v1215_v9  ;;  %970 = vmatprep.subr.bf16.mxu1 (!%p271_p10), %v1215_v9  ;;  %v1068_v11 = vld [vmem:[%s1555_s3 + $0x18] sm:$0xff] (!%p271_p10)   ;;  %vm1216_vm1 = vmmov (!%p271_p10), 0   ;;  %v886_v16 = vld [vmem:[%s1553_s1] ss:$0 sm:$0xff] (!%p271_p10)  ;;  %v1070_v22 = vld [vmem:[%s1555_s3 + $0x30] sm:$0xff] (!%p271_p10)  }
  0x12   : > { %963 = vmatpush3.bf16.msra.mxu0 (!%p271_p10), %v1065_v7  ;;  %971 = vmatpush3.bf16.msra.mxu1 (!%p271_p10), %v1066_v8  ;;  %v887_v18 = vld [vmem:[%s1554_s2] ss:$0 sm:$0xff] (!%p271_p10)  ;;  %v1071_v24 = vld [vmem:[%s1555_s3 + $0x28] sm:$0xff] (!%p271_p10)   ;;  %v1072_v25 = vld [vmem:[%s1555_s3 + $0x38] sm:$0xff] (!%p271_p10)   ;;  %s297_s18 = sand.u32 (!%p271_p10), 1, %s1197_s25   ;;  %vm422_vm2 = vcmask (!%p271_p10), 60416  }
  0x13   : > { %964 = vmatprep.subr.bf16.mxu0 (!%p271_p10), %v1215_v9  ;;  %972 = vmatprep.subr.bf16.mxu1 (!%p271_p10), %v1215_v9  ;;  %v1069_v21 = vld [vmem:[%s1555_s3 + $0x20] sm:$0xff] (!%p271_p10)   ;;  %s1377_s23 = sshll.u32 (!%p271_p10), %s297_s18, 4  ;;  %s1217_s12 = smov (!%p271_p10), 120  }
  0x14   : > { %966 = vmatprep.mubr.msk.bf16.mxu0 (!%p271_p10), %vm1216_vm1, %v1215_v9  ;;  %974 = vmatprep.mubr.msk.bf16.mxu1 (!%p271_p10), %vm1216_vm1, %v1215_v9  ;;  %v888_v26 = vld [vmem:[%s1556_s4] ss:$0 sm:$0xff] (!%p271_p10)  ;;  %v898_v27 = vld [vmem:[%s1556_s4 + $0x1] ss:$0 sm:$0xff] (!%p271_p10)  ;;  %s299_s10 = scalar_lea.vmem (!%p271_p10), [#allocation2], %s1377_s23  ;;  %s1562_s21 = smov (!%p271_p10), 112  }
  0x15   : > { %v911_v40 = vld [vmem:[%s1556_s4 + $0x2] ss:$0 sm:$0xff] (!%p271_p10)  ;;  %v924_v41 = vld [vmem:[%s1556_s4 + $0x3] ss:$0 sm:$0xff] (!%p271_p10)  ;;  %s703_s20 = sshll.u32 (!%p271_p10), %s299_s10, 4  ;;  %s1395_s22 = sshll.u32 (!%p271_p10), %s1205_s27, 8  ;;  %s1397_s20 = int_to_ptr.vmem [resolvable:$true] %s703_s20 }
  0x16   : > { %965 = vmatpush3.bf16.msra.mxu0 (!%p271_p10), %v1067_v10  ;;  %973 = vmatpush3.bf16.msra.mxu1 (!%p271_p10), %v1068_v11  ;;  %s1404_s17 = scalar_lea.hbm (!%p271_p10), %s1557_s5, %s1395_s22 }
  0x17   : > { %978 = vmatprep.subr.bf16.mxu0 (!%p271_p10), %v1215_v9  ;;  %986 = vmatprep.subr.bf16.mxu1 (!%p271_p10), %v1215_v9 }
  0x18   : > { %s315_s15 = scalar_select %p314_p11, %s1205_s27, 1 }
  0x19   : > { %s1219_s27 = smov [#allocation2]  }
  0x1a   : > { %s885_s16 = sshll.u32 %s315_s15, 3  ;;  %s1079_s8 = sshll.u32 %s1219_s27, 4  ;;  %s1080_s8 = int_to_ptr.vmem [resolvable:$false] %s1079_s8 }
  0x1b   : > { %s320_s19 = scalar_lea.vmem %s1552_s0, %s885_s16  ;;  %s1081_s30 = scalar_lea.vmem %s1080_s8, 512 }
  0x1c   : > { %v322_v0 = vld [vmem:[%s320_s19] sm:$0xff]  ;;  %s1075_s19 = scalar_lea.vmem %s1397_s20, 256  ;;  %p1082_p1 = scmp.lt.s32.totalorder %s1397_s20, %s1080_s8 }
  0x1d   : > { %v326_v1 = vsel %vm325_vm0, %v322_v0, 0.0  ;;  %p1076_p12 = scmp.ne.s32.totalorder %s1397_s20, %s1075_s19  ;;  %p1083_p2 = scmp.lt.s32.totalorder %s1081_s30, %s1075_s19 }
  0x1e   : > { %327 = vadd.xlane.f32.xlu0 %v326_v1 }
  0x1f   : > { %p1077_p13 = pnand %p1076_p12, %p1306_p4  ;;  %p1084_p3 = por %p1083_p2, %p1082_p1 }
  0x21   : > { %p1078_p0 = pneg %p1077_p13 }
  0x23   : > { %p1085_p5 = pnand %p1084_p3, %p1078_p0 }
  0xab   : > { %v328_v2 = vpop.xlane.xlu0 %327 }
  0xac   : > { %v330_v3 = vmul.f32 0.03125, %v328_v2 }
  0xae   : > { %v331_v4 = vsub.f32 %v322_v0, %v330_v3 }
  0xb0   : > { %v332_v5 = vmul.f32 %v331_v4, %v331_v4 }
  0xb2   : > { %v333_v6 = vsel %vm325_vm0, %v332_v5, 0.0 }
  0xb3   : > { %334 = vadd.xlane.f32.xlu0 %v333_v6 }
 0x140   : > { %v335_v12 = vpop.xlane.xlu0 %334 }
 0x141   : > { %v336_v13 = vmul.f32 0.03125, %v335_v12 }
 0x143   : > { %v337_v14 = vadd.f32 1e-05, %v336_v13 }
 0x145   : > { %1073 = vrsqrt.f32 %v337_v14 }
 0x14f   : > { %v1074_v15 = vpop.eup %1073 }
 0x150   : > { %v339_v17 = vmul.f32 %v1074_v15, %v331_v4 }
 0x152   : > { %v346_v19 = vmul.f32 %v886_v16, %v339_v17 }
 0x154   : > { %v353_v20 = vadd.f32 %v887_v18, %v346_v19 }
 0x156   : > { %v354_v23 = vpack.c.bf16 %v353_v20, %v353_v20 }
 0x158   : > { %967 = vmatmul.mubr.msk.bf16.vlgmr.msra.gmra.mrb[0].mxu0 %vm325_vm0, %v354_v23  ;;  %975 = vmatmul.mubr.msk.bf16.vlgmr.msra.gmra.mrb[0].mxu1 %vm325_vm0, %v354_v23 }
 0x159   : > { %979 = vmatpush3.bf16.msra.mxu0 %v1069_v21  ;;  %987 = vmatpush3.bf16.msra.mxu1 %v1070_v22 }
 0x15a   : > { %980 = vmatprep.subr.bf16.mxu0 %v1215_v9  ;;  %988 = vmatprep.subr.bf16.mxu1 %v1215_v9 }
 0x15b   : > { %982 = vmatprep.mubr.msk.bf16.mxu0 %vm1216_vm1, %v1215_v9  ;;  %990 = vmatprep.mubr.msk.bf16.mxu1 %vm1216_vm1, %v1215_v9 }
 0x15d   : > { %981 = vmatpush3.bf16.msra.mxu0 %v1071_v24  ;;  %989 = vmatpush3.bf16.msra.mxu1 %v1072_v25 }
 0x160   : > { %983 = vmatmul.mubr.msk.bf16.vlgmr.msra.gmra.mrb[4].mxu0 %vm325_vm0, %v354_v23  ;;  %991 = vmatmul.mubr.msk.bf16.vlgmr.msra.gmra.mrb[4].mxu1 %vm325_vm0, %v354_v23 }
 0x22b   : > { %v415_v28 = vpop.f32.mrb[0].mxu0  ;;  %v494_v29 = vpop.f32.mrb[0].mxu1 }
 0x22c   : > { %v416_v30 = vadd.f32 %v888_v26, %v415_v28  ;;  %v495_v31 = vadd.f32 %v898_v27, %v494_v29  ;;  %v968_v32 = vpop.f32.mrb[1].mxu0  ;;  %v976_v33 = vpop.f32.mrb[1].mxu1 }
 0x22d   : > { %v418_v34 = vpop.f32.mrb[2].mxu0  ;;  %v497_v35 = vpop.f32.mrb[2].mxu1 }
 0x22e   : > { %v421_v36 = vpack.c.bf16 %v416_v30, %v416_v30  ;;  %v500_v37 = vpack.c.bf16 %v495_v31, %v495_v31  ;;  %v969_v38 = vpop.f32.mrb[3].mxu0  ;;  %v977_v39 = vpop.f32.mrb[3].mxu1 }
 0x230   : > { %423 = vst.msk [vmem:[%s299_s10] sm:$0xf] %vm422_vm2, %v421_v36  ;;  %902 = vst.msk [vmem:[%s299_s10 + $0x4] sm:$0xf] %vm422_vm2, %v500_v37  ;;  %427 = vrot.lane.b32.xlu1 %v421_v36, %s1217_s12 }
 0x233   : > { %v575_v42 = vpop.f32.mrb[4].mxu0  ;;  %v656_v43 = vpop.f32.mrb[4].mxu1 }
 0x234   : > { %v576_v44 = vadd.f32 %v911_v40, %v575_v42  ;;  %v657_v45 = vadd.f32 %v924_v41, %v656_v43  ;;  %v992_v46 = vpop.f32.mrb[5].mxu1  ;;  %506 = vrot.lane.b32.xlu1 %v500_v37, %s1217_s12  ;;  %v984_v47 = vpop.f32.mrb[5].mxu0 }
 0x235   : > { %v578_v48 = vpop.f32.mrb[6].mxu0  ;;  %v659_v49 = vpop.f32.mrb[6].mxu1 }
 0x236   : > { %v581_v50 = vpack.c.bf16 %v576_v44, %v576_v44  ;;  %v662_v51 = vpack.c.bf16 %v657_v45, %v657_v45  ;;  %v985_v52 = vpop.f32.mrb[7].mxu0  ;;  %v993_v53 = vpop.f32.mrb[7].mxu1 }
 0x238   : > { %915 = vst.msk [vmem:[%s299_s10 + $0x8] sm:$0xf] %vm422_vm2, %v581_v50  ;;  %928 = vst.msk [vmem:[%s299_s10 + $0xc] sm:$0xf] %vm422_vm2, %v662_v51  ;;  %431 = vrot.lane.b32.xlu1 %v421_v36, %s1562_s21  ;;  %587 = vrot.lane.b32.xlu0 %v581_v50, %s1217_s12  ;;  %s1408_s10 = scalar_lea.sflag [#allocation3], %s297_s18 }
 0x23c   : > { %511 = vrot.lane.b32.xlu1 %v500_v37, %s1562_s21 }
 0x23d   : > { %1088 = shalt.err (!%p1085_p5)
}
 0x23e   : > { %s1089_s18 = scalar_lea.hbm %s1404_s17, 256  ;;  %s1093_s27 = scalar_lea.hbm %s1557_s5, 512 }
 0x23f   : > { %p1090_p6 = scmp.ne.s32.totalorder %s1404_s17, %s1089_s18  ;;  %p1094_p10 = scmp.lt.u32.totalorder %s1404_s17, %s1557_s5 }
 0x240   : > { %p1095_p11 = scmp.lt.u32.totalorder %s1093_s27, %s1089_s18  ;;  %p1097_p13 = scmp.lt.u32.totalorder %s1089_s18, %s1404_s17 }
 0x241   : > { %p1091_p7 = pnand %p1090_p6, %p1306_p4 }
 0x242   : > { %p1096_p12 = por %p1095_p11, %p1094_p10 }
 0x243   : > { %p1092_p9 = pneg %p1091_p7 }
 0x244   : > { %p1098_p0 = por %p1097_p13, %p1096_p12 }
 0x246   : > { %p1099_p1 = pnand %p1098_p0, %p1092_p9 }
 0x248   : > { %1102 = shalt.err (!%p1099_p1)
}
 0x249   : > { %s1564_s30 = smov 64   ;;  %s1221_s19 = smov 4   ;;  %668 = vrot.lane.b32.xlu1 %v662_v51, %s1217_s12 }
 0x24a   : > { %994 = dma.vmem_to_hbm [thread:$0]  (%p1306_p4), %s1397_s20, 256, %s1404_s17, %s1408_s10, %s1564_s30, %s1564_s30, %s1221_s19  }
 0x24b   : > { %s1568_s21 = smov 112   ;;  %s306_s18 = scalar_lea.vmem [#allocation4], %s1377_s23 }
 0x24c   : > { %s1442_s15 = scalar_lea.vmem [#allocation6], %s1377_s23  ;;  %s720_s12 = sshll.u32 %s306_s18, 4  ;;  %s1453_s12 = int_to_ptr.vmem [resolvable:$true] %s720_s12 }
 0x24d   : > { %592 = vrot.lane.b32.xlu1 %v581_v50, %s1568_s21  ;;  %s1569_s20 = sadd.s32 4294967295, %s1213_s29   ;;  %s1459_s23 = scalar_lea.hbm %s1558_s6, %s1395_s22 }
 0x24e   : > { %s1449_s17 = sand.u32 1, %s1569_s20   ;;  %s1103_s8 = scalar_lea.vmem %s1453_s12, 256 }
 0x24f   : > { %p1104_p2 = scmp.ne.s32.totalorder %s1453_s12, %s1103_s8 }
 0x251   : > { %673 = vrot.lane.b32.xlu1 %v662_v51, %s1568_s21  ;;  %p1105_p3 = pnand %p1104_p2, %p1306_p4  ;;  %s1222_s21 = smov [#allocation4]  }
 0x252   : > { %s1107_s20 = sshll.u32 %s1222_s21, 4  ;;  %s1108_s20 = int_to_ptr.vmem [resolvable:$false] %s1107_s20 }
 0x253   : > { %p1106_p5 = pneg %p1105_p3  ;;  %s1109_s30 = scalar_lea.vmem %s1108_s20, 512 }
 0x254   : > { %p1110_p6 = scmp.lt.s32.totalorder %s1453_s12, %s1108_s20  ;;  %p1111_p7 = scmp.lt.s32.totalorder %s1109_s30, %s1103_s8 }
 0x256   : > { %p1112_p9 = por %p1111_p7, %p1110_p6 }
 0x258   : > { %p1113_p10 = pnand %p1112_p9, %p1106_p5 }
 0x2a2   : > { %v428_v54 = vpop.permute.xlu1 %427 }
 0x2a3   : > { %430 = vst.msk [vmem:[%s306_s18] sm:$0xf] %vm422_vm2, %v428_v54 }
 0x2a6   : > { %v507_v55 = vpop.permute.xlu1 %506 }
 0x2a7   : > { %904 = vst.msk [vmem:[%s306_s18 + $0x4] sm:$0xf] %vm422_vm2, %v507_v55 }
 0x2aa   : > { %v432_v56 = vpop.permute.xlu1 %431  ;;  %v588_v57 = vpop.permute.xlu0 %587 }
 0x2ab   : > { %434 = vst.msk [vmem:[%s1442_s15] sm:$0xf] %vm422_vm2, %v432_v56  ;;  %917 = vst.msk [vmem:[%s306_s18 + $0x8] sm:$0xf] %vm422_vm2, %v588_v57 }
 0x2ae   : > { %v512_v58 = vpop.permute.xlu1 %511 }
 0x2af   : > { %905 = vst.msk [vmem:[%s1442_s15 + $0x4] sm:$0xf] %vm422_vm2, %v512_v58 }
 0x2bb   : > { %v669_v59 = vpop.permute.xlu1 %668 }
 0x2bc   : > { %930 = vst.msk [vmem:[%s306_s18 + $0xc] sm:$0xf] %vm422_vm2, %v669_v59 }
 0x2bd   : > { %1116 = shalt.err (!%p1113_p10)
}
 0x2be   : > { %s1117_s18 = scalar_lea.hbm %s1459_s23, 256  ;;  %s1121_s21 = scalar_lea.hbm %s1558_s6, 512 }
 0x2bf   : > { %p1118_p11 = scmp.ne.s32.totalorder %s1459_s23, %s1117_s18  ;;  %p1122_p0 = scmp.lt.u32.totalorder %s1459_s23, %s1558_s6 }
 0x2c0   : > { %p1123_p1 = scmp.lt.u32.totalorder %s1121_s21, %s1117_s18  ;;  %p1125_p3 = scmp.lt.u32.totalorder %s1117_s18, %s1459_s23 }
 0x2c1   : > { %p1119_p12 = pnand %p1118_p11, %p1306_p4 }
 0x2c2   : > { %p1124_p2 = por %p1123_p1, %p1122_p0 }
 0x2c3   : > { %p1120_p13 = pneg %p1119_p12 }
 0x2c4   : > { %p1126_p5 = por %p1125_p3, %p1124_p2 }
 0x2c6   : > { %p1127_p6 = pnand %p1126_p5, %p1120_p13 }
 0x2c8   : > { %1130 = shalt.err (!%p1127_p6)
}
 0x2c9   : > { %s1570_s30 = smov 64   ;;  %s1571_s8 = scalar_lea.sflag [#allocation5], %s1449_s17  ;;  %v593_v60 = vpop.permute.xlu1 %592 }
 0x2ca   : > { %995 = dma.vmem_to_hbm [thread:$0]  (%p1306_p4), %s1453_s12, 256, %s1459_s23, %s1571_s8, %s1570_s30, %s1570_s30, %s1221_s19  }
 0x2cb   : > { %s737_s27 = sshll.u32 %s1442_s15, 4  ;;  %918 = vst.msk [vmem:[%s1442_s15 + $0x8] sm:$0xf] %vm422_vm2, %v593_v60  ;;  %s1498_s16 = scalar_lea.hbm %s1559_s7, %s1395_s22  ;;  %s1492_s27 = int_to_ptr.vmem [resolvable:$true] %s737_s27 }
 0x2cc   : > { %s1131_s21 = scalar_lea.vmem %s1492_s27, 256  ;;  %s1223_s12 = smov [#allocation6]  }
 0x2cd   : > { %v674_v61 = vpop.permute.xlu1 %673  ;;  %p1132_p7 = scmp.ne.s32.totalorder %s1492_s27, %s1131_s21  ;;  %s1135_s23 = sshll.u32 %s1223_s12, 4  ;;  %s1136_s23 = int_to_ptr.vmem [resolvable:$false] %s1135_s23 }
 0x2ce   : > { %931 = vst.msk [vmem:[%s1442_s15 + $0xc] sm:$0xf] %vm422_vm2, %v674_v61  ;;  %s1137_s20 = scalar_lea.vmem %s1136_s23, 512  ;;  %p1138_p11 = scmp.lt.s32.totalorder %s1492_s27, %s1136_s23 }
 0x2cf   : > { %p1133_p9 = pnand %p1132_p7, %p1306_p4  ;;  %p1139_p12 = scmp.lt.s32.totalorder %s1137_s20, %s1131_s21 }
 0x2d1   : > { %p1134_p10 = pneg %p1133_p9  ;;  %p1140_p13 = por %p1139_p12, %p1138_p11 }
 0x2d3   : > { %p1141_p0 = pnand %p1140_p13, %p1134_p10 }
 0x2d5   : > { %1144 = shalt.err (!%p1141_p0)
}
 0x2d6   : > { %s1145_s22 = scalar_lea.hbm %s1498_s16, 256  ;;  %s1149_s18 = scalar_lea.hbm %s1559_s7, 512 }
 0x2d7   : > { %p1146_p1 = scmp.ne.s32.totalorder %s1498_s16, %s1145_s22  ;;  %p1150_p5 = scmp.lt.u32.totalorder %s1498_s16, %s1559_s7 }
 0x2d8   : > { %p1151_p6 = scmp.lt.u32.totalorder %s1149_s18, %s1145_s22  ;;  %p1153_p9 = scmp.lt.u32.totalorder %s1145_s22, %s1498_s16 }
 0x2d9   : > { %p1147_p2 = pnand %p1146_p1, %p1306_p4 }
 0x2da   : > { %p1152_p7 = por %p1151_p6, %p1150_p5 }
 0x2db   : > { %p1148_p3 = pneg %p1147_p2 }
 0x2dc   : > { %p1154_p10 = por %p1153_p9, %p1152_p7 }
 0x2de   : > { %p1155_p11 = pnand %p1154_p10, %p1148_p3 }
 0x2e0   : > { %1158 = shalt.err (!%p1155_p11)
}
 0x2e1   : > { %s1572_s21 = scalar_lea.sflag [#allocation5], %s1449_s17 }
 0x2e2   : > { %996 = dma.vmem_to_hbm [thread:$0]  (%p1306_p4), %s1492_s27, 256, %s1498_s16, %s1572_s21, %s1570_s30, %s1570_s30, %s1221_s19  }
 0x2e3 PF: > { %p1010_p12 = scmp.ge.s32.totalorder %s1213_s29, 2  ;;  %s752_s23 = sand.u32 1, %s1193_s24  }
 0x2e4   : > { %s753_s20 = scalar_lea.sflag [#allocation3], %s752_s23 }
 0x2e5   : > { %p1001_p13 = pnand %p1010_p12, %p1315_p8 }
 0x2e7   : > { %1184 = dma.done.wait (!%p1001_p13), %s753_s20, 256  }
 0x2e8   : > { %1186 = vsyncadd (!%p1001_p13), %s753_s20, 4294967040  ;;  %s1573_s11 = sadd.s32 4294967294, %s1213_s29  }
 0x2e9   : > { %s761_s22 = sand.u32 1, %s1573_s11  }
 0x2ea   : > { %s762_s15 = scalar_lea.sflag [#allocation5], %s761_s22 }
 0x2eb   : > { %1188 = dma.done.wait (!%p1001_p13), %s762_s15, 512  }
 0x2ec   : > { %1190 = vsyncadd (!%p1001_p13), %s762_s15, 4294966784  ;;  %s24_s29 = sadd.s32 1, %s1213_s29   ;;  %s1574_s24 = smov %s1197_s25 }
 0x2ed   : > { %p21_p4 = scmp.ge.s32.totalorder %s24_s29, 4   ;;  %s1575_s25 = smov %s1201_s26 }
 0x2ee   : > { %s1576_s26 = smov %s1321_s14  ;;  %s1577_s27 = smov %s1209_s28 }
 0x2ef   : > { %s1578_s28 = smov %s1580_s9  ;;  %23 = sbr.rel (!%p21_p4) target bundleno = 6 (0x6), region = 122 }
 0x2f6   :  { %776 = vsyncpa [#allocation3], 1 }
 0x2f7   :  { %778 = vsyncpa [#allocation3 + $0x1], 1 }
 0x2f8   :  { %779 = vsyncpa [#allocation5], 1 }
 0x2f9   :  { %781 = vsyncpa [#allocation5 + $0x1], 1 }

// kernel: tpu_custom_call.1
= control target key start
LH: loop header
LB: loop body
LE: loop exit
PB: predicated region body
PF: predicated region fallthrough
CT: control target
= control target key end

     0   :  { %13 = vsyncpa [#allocation3], 0  ;;  %s1552_s0 = inlined_call_operand.vmem [shape: f32[2,8,32], index: 0, kind: input, shape index: {}]   ;;  %s1553_s1 = inlined_call_operand.vmem [shape: f32[1,32], index: 1, kind: input, shape index: {}]   ;;  %s1554_s2 = inlined_call_operand.vmem [shape: f32[1,32], index: 2, kind: input, shape index: {}]   ;;  %s1555_s3 = inlined_call_operand.vmem [shape: bf16[4,32,24], index: 3, kind: input, shape index: {}]   ;;  %s1556_s4 = inlined_call_operand.vmem [shape: f32[4,1,24], index: 4, kind: input, shape index: {}]   ;;  %s1557_s5 = inlined_call_operand.hbm [shape: bf16[2,4,8,8], index: 5, kind: output, shape index: {0}]   ;;  %s1558_s6 = inlined_call_operand.hbm [shape: bf16[2,4,8,8], index: 6, kind: output, shape index: {1}]   ;;  %s1559_s7 = inlined_call_operand.hbm [shape: bf16[2,4,8,8], index: 7, kind: output, shape index: {2}]  }
   0x1   :  { %15 = vsyncpa [#allocation3 + $0x1], 0 }
   0x2   :  { %16 = vsyncpa [#allocation5], 0 }
   0x3   :  { %18 = vsyncpa [#allocation5 + $0x1], 0  ;;  %s1264_s24 = smov 0   ;;  %s1266_s25 = smov 0  }
   0x4   :  { %s1268_s26 = smov 0   ;;  %s1270_s27 = smov 0  }
   0x5   :  { %s1272_s28 = smov 0   ;;  %s1274_s29 = smov 0  }
   0x6 LB: > { %s1561_s30 = sadd.s32 4294967295, %s1213_s29   ;;  %s1560_s8 = sadd.s32 4294967294, %s1213_s29   ;;  %s1213_s29 = sphi %s1274_s29, %s24_s29   ;;  %s1209_s28 = sphi %s1272_s28, %s1578_s28   ;;  %s1205_s27 = sphi %s1270_s27, %s1577_s27   ;;  %s1201_s26 = sphi %s1268_s26, %s1576_s26   ;;  %s1197_s25 = sphi %s1266_s25, %s1575_s25   ;;  %s1193_s24 = sphi %s1264_s24, %s1574_s24  }
   0x7   : > { %s36_s9 = sadd.s32 1, %s1209_s28  ;;  %s157_s10 = sadd.s32 1, %s1201_s26 }
   0x8   : > { %p38_p0 = scmp.ge.s32.totalorder %s36_s9, 2  ;;  %p167_p1 = scmp.ne.s32.totalorder %s1201_s26, %s1197_s25 }
   0x9   : > { %p168_p2 = scmp.eq.s32.totalorder %s1561_s30, 1  ;;  %p173_p3 = scmp.ne.s32.totalorder %s1197_s25, %s1193_s24 }
   0xa   : > { %s1580_s9 = smov (%p38_p0, %s36_s9), 0  ;;  %p174_p5 = scmp.eq.s32.totalorder %s1560_s8, 1 }
   0xb   : > { %p1306_p4 = por %p168_p2, %p167_p1  ;;  %s152_s12 = ssub.s32 %s1209_s28, %s1580_s9 }
   0xc   : > { %p881_p6 = scmp.ge.s32.totalorder %s1213_s29, 1  ;;  %p155_p7 = scmp.eq.s32.totalorder %s152_s12, 0 }
   0xd   : > { %p1315_p8 = por %p174_p5, %p173_p3  ;;  %p270_p9 = scmp.lt.s32.totalorder %s1213_s29, 3 }
   0xe   : > { %s1321_s14 = scalar_select %p155_p7, %s1201_s26, %s157_s10  }
   0xf   : > { %p271_p10 = pnand %p881_p6, %p270_p9 }
  0x10   : > { %p314_p11 = scmp.lt.s32.totalorder (!%p271_p10), %s1205_s27, 1  ;;  %vm325_vm0 = vcmask (!%p271_p10), 261120   ;;  %v1065_v7 = vld [vmem:[%s1555_s3] sm:$0xff] (!%p271_p10)   ;;  %v1066_v8 = vld [vmem:[%s1555_s3 + $0x10] sm:$0xff] (!%p271_p10)   ;;  %v1215_v9 = vmov (!%p271_p10), 0.0   ;;  %v1067_v10 = vld [vmem:[%s1555_s3 + $0x8] sm:$0xff] (!%p271_p10)  }
  0x11   : > { %274 = sbr.rel (%p271_p10) target bundleno = 739 (0x2e3), region = 40  ;;  %962 = vmatprep.subr.bf16.mxu0 (!%p271_p10), %v1215_v9  ;;  %970 = vmatprep.subr.bf16.mxu1 (!%p271_p10), %v1215_v9  ;;  %v1068_v11 = vld [vmem:[%s1555_s3 + $0x18] sm:$0xff] (!%p271_p10)   ;;  %vm1216_vm1 = vmmov (!%p271_p10), 0   ;;  %v886_v16 = vld [vmem:[%s1553_s1] ss:$0 sm:$0xff] (!%p271_p10)  ;;  %v1070_v22 = vld [vmem:[%s1555_s3 + $0x30] sm:$0xff] (!%p271_p10)  }
  0x12   : > { %963 = vmatpush3.bf16.msra.mxu0 (!%p271_p10), %v1065_v7  ;;  %971 = vmatpush3.bf16.msra.mxu1 (!%p271_p10), %v1066_v8  ;;  %v887_v18 = vld [vmem:[%s1554_s2] ss:$0 sm:$0xff] (!%p271_p10)  ;;  %v1071_v24 = vld [vmem:[%s1555_s3 + $0x28] sm:$0xff] (!%p271_p10)   ;;  %v1072_v25 = vld [vmem:[%s1555_s3 + $0x38] sm:$0xff] (!%p271_p10)   ;;  %s297_s18 = sand.u32 (!%p271_p10), 1, %s1197_s25   ;;  %vm422_vm2 = vcmask (!%p271_p10), 60416  }
  0x13   : > { %964 = vmatprep.subr.bf16.mxu0 (!%p271_p10), %v1215_v9  ;;  %972 = vmatprep.subr.bf16.mxu1 (!%p271_p10), %v1215_v9  ;;  %v1069_v21 = vld [vmem:[%s1555_s3 + $0x20] sm:$0xff] (!%p271_p10)   ;;  %s1377_s23 = sshll.u32 (!%p271_p10), %s297_s18, 4  ;;  %s1217_s12 = smov (!%p271_p10), 120  }
  0x14   : > { %966 = vmatprep.mubr.msk.bf16.mxu0 (!%p271_p10), %vm1216_vm1, %v1215_v9  ;;  %974 = vmatprep.mubr.msk.bf16.mxu1 (!%p271_p10), %vm1216_vm1, %v1215_v9  ;;  %v888_v26 = vld [vmem:[%s1556_s4] ss:$0 sm:$0xff] (!%p271_p10)  ;;  %v898_v27 = vld [vmem:[%s1556_s4 + $0x1] ss:$0 sm:$0xff] (!%p271_p10)  ;;  %s299_s10 = scalar_lea.vmem (!%p271_p10), [#allocation2], %s1377_s23  ;;  %s1562_s21 = smov (!%p271_p10), 112  }
  0x15   : > { %v911_v40 = vld [vmem:[%s1556_s4 + $0x2] ss:$0 sm:$0xff] (!%p271_p10)  ;;  %v924_v41 = vld [vmem:[%s1556_s4 + $0x3] ss:$0 sm:$0xff] (!%p271_p10)  ;;  %s703_s20 = sshll.u32 (!%p271_p10), %s299_s10, 4  ;;  %s1395_s22 = sshll.u32 (!%p271_p10), %s1205_s27, 8  ;;  %s1397_s20 = int_to_ptr.vmem [resolvable:$true] %s703_s20 }
  0x16   : > { %965 = vmatpush3.bf16.msra.mxu0 (!%p271_p10), %v1067_v10  ;;  %973 = vmatpush3.bf16.msra.mxu1 (!%p271_p10), %v1068_v11  ;;  %s1404_s17 = scalar_lea.hbm (!%p271_p10), %s1557_s5, %s1395_s22 }
  0x17   : > { %978 = vmatprep.subr.bf16.mxu0 (!%p271_p10), %v1215_v9  ;;  %986 = vmatprep.subr.bf16.mxu1 (!%p271_p10), %v1215_v9 }
  0x18   : > { %s315_s15 = scalar_select %p314_p11, %s1205_s27, 1 }
  0x19   : > { %s1219_s27 = smov [#allocation2]  }
  0x1a   : > { %s885_s16 = sshll.u32 %s315_s15, 3  ;;  %s1079_s8 = sshll.u32 %s1219_s27, 4  ;;  %s1080_s8 = int_to_ptr.vmem [resolvable:$false] %s1079_s8 }
  0x1b   : > { %s320_s19 = scalar_lea.vmem %s1552_s0, %s885_s16  ;;  %s1081_s30 = scalar_lea.vmem %s1080_s8, 512 }
  0x1c   : > { %v322_v0 = vld [vmem:[%s320_s19] sm:$0xff]  ;;  %s1075_s19 = scalar_lea.vmem %s1397_s20, 256  ;;  %p1082_p1 = scmp.lt.s32.totalorder %s1397_s20, %s1080_s8 }
  0x1d   : > { %v326_v1 = vsel %vm325_vm0, %v322_v0, 0.0  ;;  %p1076_p12 = scmp.ne.s32.totalorder %s1397_s20, %s1075_s19  ;;  %p1083_p2 = scmp.lt.s32.totalorder %s1081_s30, %s1075_s19 }
  0x1e   : > { %327 = vadd.xlane.f32.xlu0 %v326_v1 }
  0x1f   : > { %p1077_p13 = pnand %p1076_p12, %p1306_p4  ;;  %p1084_p3 = por %p1083_p2, %p1082_p1 }
  0x21   : > { %p1078_p0 = pneg %p1077_p13 }
  0x23   : > { %p1085_p5 = pnand %p1084_p3, %p1078_p0 }
  0xab   : > { %v328_v2 = vpop.xlane.xlu0 %327 }
  0xac   : > { %v330_v3 = vmul.f32 0.03125, %v328_v2 }
  0xae   : > { %v331_v4 = vsub.f32 %v322_v0, %v330_v3 }
  0xb0   : > { %v332_v5 = vmul.f32 %v331_v4, %v331_v4 }
  0xb2   : > { %v333_v6 = vsel %vm325_vm0, %v332_v5, 0.0 }
  0xb3   : > { %334 = vadd.xlane.f32.xlu0 %v333_v6 }
 0x140   : > { %v335_v12 = vpop.xlane.xlu0 %334 }
 0x141   : > { %v336_v13 = vmul.f32 0.03125, %v335_v12 }
 0x143   : > { %v337_v14 = vadd.f32 1e-05, %v336_v13 }
 0x145   : > { %1073 = vrsqrt.f32 %v337_v14 }
 0x14f   : > { %v1074_v15 = vpop.eup %1073 }
 0x150   : > { %v339_v17 = vmul.f32 %v1074_v15, %v331_v4 }
 0x152   : > { %v346_v19 = vmul.f32 %v886_v16, %v339_v17 }
 0x154   : > { %v353_v20 = vadd.f32 %v887_v18, %v346_v19 }
 0x156   : > { %v354_v23 = vpack.c.bf16 %v353_v20, %v353_v20 }
 0x158   : > { %967 = vmatmul.mubr.msk.bf16.vlgmr.msra.gmra.mrb[0].mxu0 %vm325_vm0, %v354_v23  ;;  %975 = vmatmul.mubr.msk.bf16.vlgmr.msra.gmra.mrb[0].mxu1 %vm325_vm0, %v354_v23 }
 0x159   : > { %979 = vmatpush3.bf16.msra.mxu0 %v1069_v21  ;;  %987 = vmatpush3.bf16.msra.mxu1 %v1070_v22 }
 0x15a   : > { %980 = vmatprep.subr.bf16.mxu0 %v1215_v9  ;;  %988 = vmatprep.subr.bf16.mxu1 %v1215_v9 }
 0x15b   : > { %982 = vmatprep.mubr.msk.bf16.mxu0 %vm1216_vm1, %v1215_v9  ;;  %990 = vmatprep.mubr.msk.bf16.mxu1 %vm1216_vm1, %v1215_v9 }
 0x15d   : > { %981 = vmatpush3.bf16.msra.mxu0 %v1071_v24  ;;  %989 = vmatpush3.bf16.msra.mxu1 %v1072_v25 }
 0x160   : > { %983 = vmatmul.mubr.msk.bf16.vlgmr.msra.gmra.mrb[4].mxu0 %vm325_vm0, %v354_v23  ;;  %991 = vmatmul.mubr.msk.bf16.vlgmr.msra.gmra.mrb[4].mxu1 %vm325_vm0, %v354_v23 }
 0x22b   : > { %v415_v28 = vpop.f32.mrb[0].mxu0  ;;  %v494_v29 = vpop.f32.mrb[0].mxu1 }
 0x22c   : > { %v416_v30 = vadd.f32 %v888_v26, %v415_v28  ;;  %v495_v31 = vadd.f32 %v898_v27, %v494_v29  ;;  %v968_v32 = vpop.f32.mrb[1].mxu0  ;;  %v976_v33 = vpop.f32.mrb[1].mxu1 }
 0x22d   : > { %v418_v34 = vpop.f32.mrb[2].mxu0  ;;  %v497_v35 = vpop.f32.mrb[2].mxu1 }
 0x22e   : > { %v421_v36 = vpack.c.bf16 %v416_v30, %v416_v30  ;;  %v500_v37 = vpack.c.bf16 %v495_v31, %v495_v31  ;;  %v969_v38 = vpop.f32.mrb[3].mxu0  ;;  %v977_v39 = vpop.f32.mrb[3].mxu1 }
 0x230   : > { %423 = vst.msk [vmem:[%s299_s10] sm:$0xf] %vm422_vm2, %v421_v36  ;;  %902 = vst.msk [vmem:[%s299_s10 + $0x4] sm:$0xf] %vm422_vm2, %v500_v37  ;;  %427 = vrot.lane.b32.xlu1 %v421_v36, %s1217_s12 }
 0x233   : > { %v575_v42 = vpop.f32.mrb[4].mxu0  ;;  %v656_v43 = vpop.f32.mrb[4].mxu1 }
 0x234   : > { %v576_v44 = vadd.f32 %v911_v40, %v575_v42  ;;  %v657_v45 = vadd.f32 %v924_v41, %v656_v43  ;;  %v992_v46 = vpop.f32.mrb[5].mxu1  ;;  %506 = vrot.lane.b32.xlu1 %v500_v37, %s1217_s12  ;;  %v984_v47 = vpop.f32.mrb[5].mxu0 }
 0x235   : > { %v578_v48 = vpop.f32.mrb[6].mxu0  ;;  %v659_v49 = vpop.f32.mrb[6].mxu1 }
 0x236   : > { %v581_v50 = vpack.c.bf16 %v576_v44, %v576_v44  ;;  %v662_v51 = vpack.c.bf16 %v657_v45, %v657_v45  ;;  %v985_v52 = vpop.f32.mrb[7].mxu0  ;;  %v993_v53 = vpop.f32.mrb[7].mxu1 }
 0x238   : > { %915 = vst.msk [vmem:[%s299_s10 + $0x8] sm:$0xf] %vm422_vm2, %v581_v50  ;;  %928 = vst.msk [vmem:[%s299_s10 + $0xc] sm:$0xf] %vm422_vm2, %v662_v51  ;;  %431 = vrot.lane.b32.xlu1 %v421_v36, %s1562_s21  ;;  %587 = vrot.lane.b32.xlu0 %v581_v50, %s1217_s12  ;;  %s1408_s10 = scalar_lea.sflag [#allocation3], %s297_s18 }
 0x23c   : > { %511 = vrot.lane.b32.xlu1 %v500_v37, %s1562_s21 }
 0x23d   : > { %1088 = shalt.err (!%p1085_p5)
}
 0x23e   : > { %s1089_s18 = scalar_lea.hbm %s1404_s17, 256  ;;  %s1093_s27 = scalar_lea.hbm %s1557_s5, 512 }
 0x23f   : > { %p1090_p6 = scmp.ne.s32.totalorder %s1404_s17, %s1089_s18  ;;  %p1094_p10 = scmp.lt.u32.totalorder %s1404_s17, %s1557_s5 }
 0x240   : > { %p1095_p11 = scmp.lt.u32.totalorder %s1093_s27, %s1089_s18  ;;  %p1097_p13 = scmp.lt.u32.totalorder %s1089_s18, %s1404_s17 }
 0x241   : > { %p1091_p7 = pnand %p1090_p6, %p1306_p4 }
 0x242   : > { %p1096_p12 = por %p1095_p11, %p1094_p10 }
 0x243   : > { %p1092_p9 = pneg %p1091_p7 }
 0x244   : > { %p1098_p0 = por %p1097_p13, %p1096_p12 }
 0x246   : > { %p1099_p1 = pnand %p1098_p0, %p1092_p9 }
 0x248   : > { %1102 = shalt.err (!%p1099_p1)
}
 0x249   : > { %s1564_s30 = smov 64   ;;  %s1221_s19 = smov 4   ;;  %668 = vrot.lane.b32.xlu1 %v662_v51, %s1217_s12 }
 0x24a   : > { %994 = dma.vmem_to_hbm [thread:$0]  (%p1306_p4), %s1397_s20, 256, %s1404_s17, %s1408_s10, %s1564_s30, %s1564_s30, %s1221_s19  }
 0x24b   : > { %s1568_s21 = smov 112   ;;  %s306_s18 = scalar_lea.vmem [#allocation4], %s1377_s23 }
 0x24c   : > { %s1442_s15 = scalar_lea.vmem [#allocation6], %s1377_s23  ;;  %s720_s12 = sshll.u32 %s306_s18, 4  ;;  %s1453_s12 = int_to_ptr.vmem [resolvable:$true] %s720_s12 }
 0x24d   : > { %592 = vrot.lane.b32.xlu1 %v581_v50, %s1568_s21  ;;  %s1569_s20 = sadd.s32 4294967295, %s1213_s29   ;;  %s1459_s23 = scalar_lea.hbm %s1558_s6, %s1395_s22 }
 0x24e   : > { %s1449_s17 = sand.u32 1, %s1569_s20   ;;  %s1103_s8 = scalar_lea.vmem %s1453_s12, 256 }
 0x24f   : > { %p1104_p2 = scmp.ne.s32.totalorder %s1453_s12, %s1103_s8 }
 0x251   : > { %673 = vrot.lane.b32.xlu1 %v662_v51, %s1568_s21  ;;  %p1105_p3 = pnand %p1104_p2, %p1306_p4  ;;  %s1222_s21 = smov [#allocation4]  }
 0x252   : > { %s1107_s20 = sshll.u32 %s1222_s21, 4  ;;  %s1108_s20 = int_to_ptr.vmem [resolvable:$false] %s1107_s20 }
 0x253   : > { %p1106_p5 = pneg %p1105_p3  ;;  %s1109_s30 = scalar_lea.vmem %s1108_s20, 512 }
 0x254   : > { %p1110_p6 = scmp.lt.s32.totalorder %s1453_s12, %s1108_s20  ;;  %p1111_p7 = scmp.lt.s32.totalorder %s1109_s30, %s1103_s8 }
 0x256   : > { %p1112_p9 = por %p1111_p7, %p1110_p6 }
 0x258   : > { %p1113_p10 = pnand %p1112_p9, %p1106_p5 }
 0x2a2   : > { %v428_v54 = vpop.permute.xlu1 %427 }
 0x2a3   : > { %430 = vst.msk [vmem:[%s306_s18] sm:$0xf] %vm422_vm2, %v428_v54 }
 0x2a6   : > { %v507_v55 = vpop.permute.xlu1 %506 }
 0x2a7   : > { %904 = vst.msk [vmem:[%s306_s18 + $0x4] sm:$0xf] %vm422_vm2, %v507_v55 }
 0x2aa   : > { %v432_v56 = vpop.permute.xlu1 %431  ;;  %v588_v57 = vpop.permute.xlu0 %587 }
 0x2ab   : > { %434 = vst.msk [vmem:[%s1442_s15] sm:$0xf] %vm422_vm2, %v432_v56  ;;  %917 = vst.msk [vmem:[%s306_s18 + $0x8] sm:$0xf] %vm422_vm2, %v588_v57 }
 0x2ae   : > { %v512_v58 = vpop.permute.xlu1 %511 }
 0x2af   : > { %905 = vst.msk [vmem:[%s1442_s15 + $0x4] sm:$0xf] %vm422_vm2, %v512_v58 }
 0x2bb   : > { %v669_v59 = vpop.permute.xlu1 %668 }
 0x2bc   : > { %930 = vst.msk [vmem:[%s306_s18 + $0xc] sm:$0xf] %vm422_vm2, %v669_v59 }
 0x2bd   : > { %1116 = shalt.err (!%p1113_p10)
}
 0x2be   : > { %s1117_s18 = scalar_lea.hbm %s1459_s23, 256  ;;  %s1121_s21 = scalar_lea.hbm %s1558_s6, 512 }
 0x2bf   : > { %p1118_p11 = scmp.ne.s32.totalorder %s1459_s23, %s1117_s18  ;;  %p1122_p0 = scmp.lt.u32.totalorder %s1459_s23, %s1558_s6 }
 0x2c0   : > { %p1123_p1 = scmp.lt.u32.totalorder %s1121_s21, %s1117_s18  ;;  %p1125_p3 = scmp.lt.u32.totalorder %s1117_s18, %s1459_s23 }
 0x2c1   : > { %p1119_p12 = pnand %p1118_p11, %p1306_p4 }
 0x2c2   : > { %p1124_p2 = por %p1123_p1, %p1122_p0 }
 0x2c3   : > { %p1120_p13 = pneg %p1119_p12 }
 0x2c4   : > { %p1126_p5 = por %p1125_p3, %p1124_p2 }
 0x2c6   : > { %p1127_p6 = pnand %p1126_p5, %p1120_p13 }
 0x2c8   : > { %1130 = shalt.err (!%p1127_p6)
}
 0x2c9   : > { %s1570_s30 = smov 64   ;;  %s1571_s8 = scalar_lea.sflag [#allocation5], %s1449_s17  ;;  %v593_v60 = vpop.permute.xlu1 %592 }
 0x2ca   : > { %995 = dma.vmem_to_hbm [thread:$0]  (%p1306_p4), %s1453_s12, 256, %s1459_s23, %s1571_s8, %s1570_s30, %s1570_s30, %s1221_s19  }
 0x2cb   : > { %s737_s27 = sshll.u32 %s1442_s15, 4  ;;  %918 = vst.msk [vmem:[%s1442_s15 + $0x8] sm:$0xf] %vm422_vm2, %v593_v60  ;;  %s1498_s16 = scalar_lea.hbm %s1559_s7, %s1395_s22  ;;  %s1492_s27 = int_to_ptr.vmem [resolvable:$true] %s737_s27 }
 0x2cc   : > { %s1131_s21 = scalar_lea.vmem %s1492_s27, 256  ;;  %s1223_s12 = smov [#allocation6]  }
 0x2cd   : > { %v674_v61 = vpop.permute.xlu1 %673  ;;  %p1132_p7 = scmp.ne.s32.totalorder %s1492_s27, %s1131_s21  ;;  %s1135_s23 = sshll.u32 %s1223_s12, 4  ;;  %s1136_s23 = int_to_ptr.vmem [resolvable:$false] %s1135_s23 }
 0x2ce   : > { %931 = vst.msk [vmem:[%s1442_s15 + $0xc] sm:$0xf] %vm422_vm2, %v674_v61  ;;  %s1137_s20 = scalar_lea.vmem %s1136_s23, 512  ;;  %p1138_p11 = scmp.lt.s32.totalorder %s1492_s27, %s1136_s23 }
 0x2cf   : > { %p1133_p9 = pnand %p1132_p7, %p1306_p4  ;;  %p1139_p12 = scmp.lt.s32.totalorder %s1137_s20, %s1131_s21 }
 0x2d1   : > { %p1134_p10 = pneg %p1133_p9  ;;  %p1140_p13 = por %p1139_p12, %p1138_p11 }
 0x2d3   : > { %p1141_p0 = pnand %p1140_p13, %p1134_p10 }
 0x2d5   : > { %1144 = shalt.err (!%p1141_p0)
}
 0x2d6   : > { %s1145_s22 = scalar_lea.hbm %s1498_s16, 256  ;;  %s1149_s18 = scalar_lea.hbm %s1559_s7, 512 }
 0x2d7   : > { %p1146_p1 = scmp.ne.s32.totalorder %s1498_s16, %s1145_s22  ;;  %p1150_p5 = scmp.lt.u32.totalorder %s1498_s16, %s1559_s7 }
 0x2d8   : > { %p1151_p6 = scmp.lt.u32.totalorder %s1149_s18, %s1145_s22  ;;  %p1153_p9 = scmp.lt.u32.totalorder %s1145_s22, %s1498_s16 }
 0x2d9   : > { %p1147_p2 = pnand %p1146_p1, %p1306_p4 }
 0x2da   : > { %p1152_p7 = por %p1151_p6, %p1150_p5 }
 0x2db   : > { %p1148_p3 = pneg %p1147_p2 }
 0x2dc   : > { %p1154_p10 = por %p1153_p9, %p1152_p7 }
 0x2de   : > { %p1155_p11 = pnand %p1154_p10, %p1148_p3 }
 0x2e0   : > { %1158 = shalt.err (!%p1155_p11)
}
 0x2e1   : > { %s1572_s21 = scalar_lea.sflag [#allocation5], %s1449_s17 }
 0x2e2   : > { %996 = dma.vmem_to_hbm [thread:$0]  (%p1306_p4), %s1492_s27, 256, %s1498_s16, %s1572_s21, %s1570_s30, %s1570_s30, %s1221_s19  }
 0x2e3 PF: > { %p1010_p12 = scmp.ge.s32.totalorder %s1213_s29, 2  ;;  %s752_s23 = sand.u32 1, %s1193_s24  }
 0x2e4   : > { %s753_s20 = scalar_lea.sflag [#allocation3], %s752_s23 }
 0x2e5   : > { %p1001_p13 = pnand %p1010_p12, %p1315_p8 }
 0x2e7   : > { %1184 = dma.done.wait (!%p1001_p13), %s753_s20, 256  }
 0x2e8   : > { %1186 = vsyncadd (!%p1001_p13), %s753_s20, 4294967040  ;;  %s1573_s11 = sadd.s32 4294967294, %s1213_s29  }
 0x2e9   : > { %s761_s22 = sand.u32 1, %s1573_s11  }
 0x2ea   : > { %s762_s15 = scalar_lea.sflag [#allocation5], %s761_s22 }
 0x2eb   : > { %1188 = dma.done.wait (!%p1001_p13), %s762_s15, 512  }
 0x2ec   : > { %1190 = vsyncadd (!%p1001_p13), %s762_s15, 4294966784  ;;  %s24_s29 = sadd.s32 1, %s1213_s29   ;;  %s1574_s24 = smov %s1197_s25 }
 0x2ed   : > { %p21_p4 = scmp.ge.s32.totalorder %s24_s29, 4   ;;  %s1575_s25 = smov %s1201_s26 }
 0x2ee   : > { %s1576_s26 = smov %s1321_s14  ;;  %s1577_s27 = smov %s1209_s28 }
 0x2ef   : > { %s1578_s28 = smov %s1580_s9  ;;  %23 = sbr.rel (!%p21_p4) target bundleno = 6 (0x6), region = 122 }
 0x2f6   :  { %776 = vsyncpa [#allocation3], 1 }
 0x2f7   :  { %778 = vsyncpa [#allocation3 + $0x1], 1 }
 0x2f8   :  { %779 = vsyncpa [#allocation5], 1 }
 0x2f9   :  { %781 = vsyncpa [#allocation5 + $0x1], 1 }

</bundles_post_ra>
